<compile_context>
chip_gen: v7x
topology: tpu7x:2x2x1
jax: 0.10.0
libtpu: 0.0.40
codegen_flags: <defaults>
</compile_context>

<pallas_src>
import jax
import jax.numpy as jnp
from jax.experimental import pallas as pl
from jax.experimental.pallas import tpu as pltpu

_EPS = 1e-5
# tap order k = (dh+1)*3 + (dw+1) == kh*3 + kw  (matches the packed weight row order)
_TAPS = tuple((dh, dw) for dh in (-1, 0, 1) for dw in (-1, 0, 1))


def down_convolution(x_nchw, params):
    N, Cin, H, W = x_nchw.shape
    Hp, Wp = H // 2, W // 2
    P = N * Hp * Wp
    Cout = params["w1"].shape[0]
    COP = ((Cout + 127) // 128) * 128          # lane-dense padded channel width

    # ------------- wrapper: pure layout / constant plumbing (plain JAX) -------------
    # NCHW -> NHWC, then a free (row-major-preserving) reshape exposing the 2x2 window.
    x = jnp.transpose(x_nchw, (0, 2, 3, 1)).astype(jnp.float32)
    x4 = x.reshape(N * Hp, 2, Wp, 2 * Cin)
    # TODO(synk): for large H/W/N, restructure to a lane-dense input layout
    # (trailing dim >= 128) and pool via sublane max + lane select inside the kernel.

    def pack_w(wt):
        # (Co, Ci, 3, 3) -> (9*Ci, COP); row index = (kh*3 + kw)*Ci + ci, zero-padded cols
        co, ci = wt.shape[0], wt.shape[1]
        w2d = jnp.transpose(wt, (2, 3, 1, 0)).reshape(9 * ci, co).astype(jnp.float32)
        return jnp.pad(w2d, ((0, 0), (0, COP - co)))

    def pack_v(v):
        # (Co,) -> (1, COP); zero padding keeps padded channels exactly 0 after BN+ReLU
        return jnp.pad(v.astype(jnp.float32).reshape(1, -1), ((0, 0), (0, COP - v.shape[0])))

    w1p, g1p, bt1p = pack_w(params["w1"]), pack_v(params["g1"]), pack_v(params["bt1"])
    w2p, g2p, bt2p = pack_w(params["w2"]), pack_v(params["g2"]), pack_v(params["bt2"])
    # NOTE: conv biases b1/b2 intentionally not passed: training-mode BN cancels them.

    # Multiplicative border masks for the 9 taps, expanded to slab width.
    pidx = jnp.arange(P, dtype=jnp.int32)
    hh = (pidx // Wp) % Hp
    ww = pidx % Wp
    cols = []
    for dh, dw in _TAPS:
        m = ((hh + dh >= 0) & (hh + dh <= Hp - 1) &
             (ww + dw >= 0) & (ww + dw <= Wp - 1))
        cols.append(m)
    mask9 = jnp.stack(cols, axis=1).astype(jnp.float32)          # (P, 9), tap-major
    mask1 = jnp.repeat(mask9, Cin, axis=1)                       # (P, 9*Cin)
    mask2 = jnp.repeat(mask9, Cout, axis=1)                      # (P, 9*Cout)

    # --------------------------------- kernel ---------------------------------
    def shift_rows(v, s):
        # dest row p <- v[p + s]; rows whose source is out of range get 0
        # (those destinations are border rows and are zeroed by the mask anyway).
        if s == 0:
            return v
        c = v.shape[-1]
        z = jnp.zeros((abs(s), c), jnp.float32)
        if s > 0:
            return jnp.concatenate([v[s:, :], z], axis=0)
        return jnp.concatenate([z, v[:s, :]], axis=0)

    def kernel(x_ref, w1_ref, g1_ref, bt1_ref, w2_ref, g2_ref, bt2_ref,
               m1_ref, m2_ref, o_ref):
        # ---- MaxPool2d(2): two vector maxes over the 2x2 window ----
        xin = x_ref[...]                                   # (N*Hp, 2, Wp, 2*Cin)
        xv = jnp.maximum(xin[:, 0], xin[:, 1])             # max over the two pooled rows
        xp = jnp.maximum(xv[..., :Cin], xv[..., Cin:])     # max over the two pooled cols
        xp = xp.reshape(P, Cin)                            # rows in (n, h, w) order

        # ones matrix for MXU-based batch reductions (8 identical rows -> aligned matmul)
        ones8 = jnp.ones((8, P), jnp.float32)

        def conv_bn_relu(src, w_ref, g_ref, bt_ref, m_ref):
            """3x3 conv (pad=1) + folded training-mode BN + ReLU: (P, c) -> (P, COP)."""
            # im2col slab built in registers: 9 row-shifted taps, one concat, one
            # lane-dense border-mask multiply.  No VMEM scratch, no strip stores.
            taps = [shift_rows(src, dh * Wp + dw) for dh, dw in _TAPS]
            slab = jnp.concatenate(taps, axis=1) * m_ref[...]        # (P, 9c)

            # One fused MXU matmul per conv, f32 accumulation.
            acc = jnp.dot(slab, w_ref[...],
                          preferred_element_type=jnp.float32)        # (P, COP)

            # Training-mode BN: batch sums via ones-matrix matmuls on the idle MXU
            # (keeps the XLU free), folded into a single scale + shift.
            s1 = jnp.dot(ones8, acc, preferred_element_type=jnp.float32)[0:1, :]
            s2 = jnp.dot(ones8, acc * acc, preferred_element_type=jnp.float32)[0:1, :]
            mean = s1 * (1.0 / P)
            var = jnp.maximum(s2 * (1.0 / P) - mean * mean, 0.0)     # clamp: no NaN rsqrt
            scale = g_ref[...] * jax.lax.rsqrt(var + _EPS)           # EUP
            shift = bt_ref[...] - mean * scale
            return jnp.maximum(acc * scale + shift, 0.0)             # ReLU

        h1 = conv_bn_relu(xp, w1_ref, g1_ref, bt1_ref, m1_ref)       # (P, COP)
        h1n = h1[:, :Cout]            # only real channels survive; full h1 dies here
        h2 = conv_bn_relu(h1n, w2_ref, g2_ref, bt2_ref, m2_ref)      # (P, COP)
        o_ref[...] = h2                                              # lane-dense store

    # ------------------------------ pallas_call ------------------------------
    flops = (2 * P * (9 * Cin) * COP + 2 * P * (9 * Cout) * COP   # conv matmuls
             + 2 * (2 * 2 * 8 * P * COP))                          # BN ones-matmuls
    bytes_accessed = 4 * (x4.size + w1p.size + w2p.size + g1p.size + bt1p.size
                          + g2p.size + bt2p.size + mask1.size + mask2.size + P * COP)
    vmem = pl.BlockSpec(memory_space=pltpu.MemorySpace.VMEM)

    out2d = pl.pallas_call(
        kernel,
        out_shape=jax.ShapeDtypeStruct((P, COP), jnp.float32),
        in_specs=[vmem] * 9,
        out_specs=vmem,
        cost_estimate=pl.CostEstimate(flops=flops, transcendentals=2 * COP,
                                      bytes_accessed=bytes_accessed),
    )(x4, w1p, g1p, bt1p, w2p, g2p, bt2p, mask1, mask2)

    # strip channel padding and return to NCHW
    out = out2d[:, :Cout].reshape(N, Hp, Wp, Cout)
    return jnp.transpose(out, (0, 3, 1, 2))


def reference(x, params):
    """Pure-JAX reference matching the PyTorch forward semantics."""
    N, C, H, W = x.shape
    xp = x.reshape(N, C, H // 2, 2, W // 2, 2).max(axis=(3, 5))

    def conv_bn_relu(h, w, b, g, bt):
        y = jax.lax.conv_general_dilated(
            h, w, window_strides=(1, 1), padding=((1, 1), (1, 1)),
            dimension_numbers=("NCHW", "OIHW", "NCHW"))
        y = y + b[None, :, None, None]
        mean = y.mean(axis=(0, 2, 3), keepdims=True)
        var = ((y - mean) ** 2).mean(axis=(0, 2, 3), keepdims=True)
        y = (y - mean) * jax.lax.rsqrt(var + _EPS)
        y = y * g[None, :, None, None] + bt[None, :, None, None]
        return jnp.maximum(y, 0.0)

    h = conv_bn_relu(xp, params["w1"], params["b1"], params["g1"], params["bt1"])
    h = conv_bn_relu(h, params["w2"], params["b2"], params["g2"], params["bt2"])
    return h


if __name__ == "__main__":
    key = jax.random.PRNGKey(0)
    keys = jax.random.split(key, 9)
    in_ch, out_ch = 4, 8
    x = jax.random.normal(keys[0], (2, in_ch, 16, 16), jnp.float32)
    params = {
        "w1": 0.2 * jax.random.normal(keys[1], (out_ch, in_ch, 3, 3), jnp.float32),
        "b1": 0.1 * jax.random.normal(keys[2], (out_ch,), jnp.float32),
        "g1": 1.0 + 0.1 * jax.random.normal(keys[3], (out_ch,), jnp.float32),
        "bt1": 0.1 * jax.random.normal(keys[4], (out_ch,), jnp.float32),
        "w2": 0.2 * jax.random.normal(keys[5], (out_ch, out_ch, 3, 3), jnp.float32),
        "b2": 0.1 * jax.random.normal(keys[6], (out_ch,), jnp.float32),
        "g2": 1.0 + 0.1 * jax.random.normal(keys[7], (out_ch,), jnp.float32),
        "bt2": 0.1 * jax.random.normal(keys[8], (out_ch,), jnp.float32),
    }

    out = jax.block_until_ready(down_convolution(x, params))
    ref = jax.block_until_ready(reference(x, params))

    assert out.shape == (2, out_ch, 8, 8), out.shape
    max_err = float(jnp.max(jnp.abs(out - ref)))
    assert jnp.allclose(out, ref, atol=2e-4, rtol=2e-4), max_err
    print("KERNEL_OK")
</pallas_src>

<mosaic_0001>
module attributes {stable_mosaic.version = 11 : i64} {
  func.func @kernel(%arg0: memref<16x2x8x8xf32, #tpu.memory_space<vmem>>, %arg1: memref<36x128xf32, #tpu.memory_space<vmem>>, %arg2: memref<1x128xf32, #tpu.memory_space<vmem>>, %arg3: memref<1x128xf32, #tpu.memory_space<vmem>>, %arg4: memref<72x128xf32, #tpu.memory_space<vmem>>, %arg5: memref<1x128xf32, #tpu.memory_space<vmem>>, %arg6: memref<1x128xf32, #tpu.memory_space<vmem>>, %arg7: memref<128x36xf32, #tpu.memory_space<vmem>>, %arg8: memref<128x72xf32, #tpu.memory_space<vmem>>, %arg9: memref<128x128xf32, #tpu.memory_space<vmem>>) attributes {dimension_semantics = [], scalar_prefetch = 0 : i64, scratch_operands = 0 : i64, tpu.core_type = #tpu.core_type<tc>} {
    %c0 = arith.constant 0 : index
    %c0_0 = arith.constant 0 : index
    %c0_1 = arith.constant 0 : index
    %c0_2 = arith.constant 0 : index
    %0 = vector.load %arg0[%c0, %c0_0, %c0_1, %c0_2] : memref<16x2x8x8xf32, #tpu.memory_space<vmem>>, vector<16x2x8x8xf32>
    %1 = vector.extract_strided_slice %0 {offsets = [0, 0, 0, 0], sizes = [16, 1, 8, 8], strides = [1, 1, 1, 1]} : vector<16x2x8x8xf32> to vector<16x1x8x8xf32>
    %2 = vector.shape_cast %1 : vector<16x1x8x8xf32> to vector<16x8x8xf32>
    %3 = vector.extract_strided_slice %0 {offsets = [0, 1, 0, 0], sizes = [16, 1, 8, 8], strides = [1, 1, 1, 1]} : vector<16x2x8x8xf32> to vector<16x1x8x8xf32>
    %4 = vector.shape_cast %3 : vector<16x1x8x8xf32> to vector<16x8x8xf32>
    %5 = arith.maximumf %2, %4 : vector<16x8x8xf32>
    %6 = vector.extract_strided_slice %5 {offsets = [0, 0, 0], sizes = [16, 8, 4], strides = [1, 1, 1]} : vector<16x8x8xf32> to vector<16x8x4xf32>
    %7 = vector.extract_strided_slice %5 {offsets = [0, 0, 4], sizes = [16, 8, 4], strides = [1, 1, 1]} : vector<16x8x8xf32> to vector<16x8x4xf32>
    %8 = arith.maximumf %6, %7 : vector<16x8x4xf32>
    %9 = vector.shape_cast %8 : vector<16x8x4xf32> to vector<128x4xf32>
    %cst = arith.constant 1.000000e+00 : f32
    %10 = vector.broadcast %cst : f32 to vector<8x128xf32>
    %cst_3 = arith.constant 0.000000e+00 : f32
    %11 = vector.broadcast %cst_3 : f32 to vector<9x4xf32>
    %12 = vector.extract_strided_slice %9 {offsets = [0, 0], sizes = [119, 4], strides = [1, 1]} : vector<128x4xf32> to vector<119x4xf32>
    %13 = tpu.concatenate %11, %12 in 0 : vector<9x4xf32>, vector<119x4xf32> -> vector<128x4xf32>
    %cst_4 = arith.constant 0.000000e+00 : f32
    %14 = vector.broadcast %cst_4 : f32 to vector<8x4xf32>
    %15 = vector.extract_strided_slice %9 {offsets = [0, 0], sizes = [120, 4], strides = [1, 1]} : vector<128x4xf32> to vector<120x4xf32>
    %16 = tpu.concatenate %14, %15 in 0 : vector<8x4xf32>, vector<120x4xf32> -> vector<128x4xf32>
    %cst_5 = arith.constant 0.000000e+00 : f32
    %17 = vector.broadcast %cst_5 : f32 to vector<7x4xf32>
    %18 = vector.extract_strided_slice %9 {offsets = [0, 0], sizes = [121, 4], strides = [1, 1]} : vector<128x4xf32> to vector<121x4xf32>
    %19 = tpu.concatenate %17, %18 in 0 : vector<7x4xf32>, vector<121x4xf32> -> vector<128x4xf32>
    %cst_6 = arith.constant 0.000000e+00 : f32
    %20 = vector.broadcast %cst_6 : f32 to vector<1x4xf32>
    %21 = vector.extract_strided_slice %9 {offsets = [0, 0], sizes = [127, 4], strides = [1, 1]} : vector<128x4xf32> to vector<127x4xf32>
    %22 = tpu.concatenate %20, %21 in 0 : vector<1x4xf32>, vector<127x4xf32> -> vector<128x4xf32>
    %cst_7 = arith.constant 0.000000e+00 : f32
    %23 = vector.broadcast %cst_7 : f32 to vector<1x4xf32>
    %24 = vector.extract_strided_slice %9 {offsets = [1, 0], sizes = [127, 4], strides = [1, 1]} : vector<128x4xf32> to vector<127x4xf32>
    %25 = tpu.concatenate %24, %23 in 0 : vector<127x4xf32>, vector<1x4xf32> -> vector<128x4xf32>
    %cst_8 = arith.constant 0.000000e+00 : f32
    %26 = vector.broadcast %cst_8 : f32 to vector<7x4xf32>
    %27 = vector.extract_strided_slice %9 {offsets = [7, 0], sizes = [121, 4], strides = [1, 1]} : vector<128x4xf32> to vector<121x4xf32>
    %28 = tpu.concatenate %27, %26 in 0 : vector<121x4xf32>, vector<7x4xf32> -> vector<128x4xf32>
    %cst_9 = arith.constant 0.000000e+00 : f32
    %29 = vector.broadcast %cst_9 : f32 to vector<8x4xf32>
    %30 = vector.extract_strided_slice %9 {offsets = [8, 0], sizes = [120, 4], strides = [1, 1]} : vector<128x4xf32> to vector<120x4xf32>
    %31 = tpu.concatenate %30, %29 in 0 : vector<120x4xf32>, vector<8x4xf32> -> vector<128x4xf32>
    %cst_10 = arith.constant 0.000000e+00 : f32
    %32 = vector.broadcast %cst_10 : f32 to vector<9x4xf32>
    %33 = vector.extract_strided_slice %9 {offsets = [9, 0], sizes = [119, 4], strides = [1, 1]} : vector<128x4xf32> to vector<119x4xf32>
    %34 = tpu.concatenate %33, %32 in 0 : vector<119x4xf32>, vector<9x4xf32> -> vector<128x4xf32>
    %35 = tpu.concatenate %13, %16, %19, %22, %9, %25, %28, %31, %34 in 1 : vector<128x4xf32>, vector<128x4xf32>, vector<128x4xf32>, vector<128x4xf32>, vector<128x4xf32>, vector<128x4xf32>, vector<128x4xf32>, vector<128x4xf32>, vector<128x4xf32> -> vector<128x36xf32>
    %c0_11 = arith.constant 0 : index
    %c0_12 = arith.constant 0 : index
    %36 = vector.load %arg7[%c0_11, %c0_12] : memref<128x36xf32, #tpu.memory_space<vmem>>, vector<128x36xf32>
    %37 = arith.mulf %35, %36 : vector<128x36xf32>
    %c0_13 = arith.constant 0 : index
    %c0_14 = arith.constant 0 : index
    %38 = vector.load %arg1[%c0_13, %c0_14] : memref<36x128xf32, #tpu.memory_space<vmem>>, vector<36x128xf32>
    %cst_15 = arith.constant dense<0.000000e+00> : vector<128x128xf32>
    %39 = tpu.matmul %37, %38, %cst_15 {dimension_numbers = #tpu.dot_dimension_numbers<[1], [0], [0], [1], [0, 0, 1, 1], [], []>} : vector<128x36xf32>, vector<36x128xf32>, vector<128x128xf32> -> vector<128x128xf32>
    %cst_16 = arith.constant dense<0.000000e+00> : vector<8x128xf32>
    %40 = tpu.matmul %10, %39, %cst_16 {dimension_numbers = #tpu.dot_dimension_numbers<[1], [0], [0], [1], [0, 0, 1, 1], [], []>} : vector<8x128xf32>, vector<128x128xf32>, vector<8x128xf32> -> vector<8x128xf32>
    %41 = vector.extract_strided_slice %40 {offsets = [0, 0], sizes = [1, 128], strides = [1, 1]} : vector<8x128xf32> to vector<1x128xf32>
    %42 = arith.mulf %39, %39 : vector<128x128xf32>
    %cst_17 = arith.constant dense<0.000000e+00> : vector<8x128xf32>
    %43 = tpu.matmul %10, %42, %cst_17 {dimension_numbers = #tpu.dot_dimension_numbers<[1], [0], [0], [1], [0, 0, 1, 1], [], []>} : vector<8x128xf32>, vector<128x128xf32>, vector<8x128xf32> -> vector<8x128xf32>
    %44 = vector.extract_strided_slice %43 {offsets = [0, 0], sizes = [1, 128], strides = [1, 1]} : vector<8x128xf32> to vector<1x128xf32>
    %cst_18 = arith.constant 7.812500e-03 : f32
    %45 = vector.broadcast %cst_18 : f32 to vector<1x128xf32>
    %46 = arith.mulf %41, %45 : vector<1x128xf32>
    %cst_19 = arith.constant 7.812500e-03 : f32
    %47 = vector.broadcast %cst_19 : f32 to vector<1x128xf32>
    %48 = arith.mulf %44, %47 : vector<1x128xf32>
    %49 = arith.mulf %46, %46 : vector<1x128xf32>
    %50 = arith.subf %48, %49 : vector<1x128xf32>
    %cst_20 = arith.constant 0.000000e+00 : f32
    %51 = vector.broadcast %cst_20 : f32 to vector<1x128xf32>
    %52 = arith.maximumf %50, %51 : vector<1x128xf32>
    %c0_21 = arith.constant 0 : index
    %c0_22 = arith.constant 0 : index
    %53 = vector.load %arg2[%c0_21, %c0_22] : memref<1x128xf32, #tpu.memory_space<vmem>>, vector<1x128xf32>
    %cst_23 = arith.constant 9.99999974E-6 : f32
    %54 = vector.broadcast %cst_23 : f32 to vector<1x128xf32>
    %55 = arith.addf %52, %54 : vector<1x128xf32>
    %56 = math.rsqrt %55 : vector<1x128xf32>
    %57 = arith.mulf %53, %56 : vector<1x128xf32>
    %c0_24 = arith.constant 0 : index
    %c0_25 = arith.constant 0 : index
    %58 = vector.load %arg3[%c0_24, %c0_25] : memref<1x128xf32, #tpu.memory_space<vmem>>, vector<1x128xf32>
    %59 = arith.mulf %46, %57 : vector<1x128xf32>
    %60 = arith.subf %58, %59 : vector<1x128xf32>
    %61 = vector.broadcast %57 : vector<1x128xf32> to vector<128x128xf32>
    %62 = arith.mulf %39, %61 : vector<128x128xf32>
    %63 = vector.broadcast %60 : vector<1x128xf32> to vector<128x128xf32>
    %64 = arith.addf %62, %63 : vector<128x128xf32>
    %cst_26 = arith.constant 0.000000e+00 : f32
    %65 = vector.broadcast %cst_26 : f32 to vector<128x128xf32>
    %66 = arith.maximumf %64, %65 : vector<128x128xf32>
    %67 = vector.extract_strided_slice %66 {offsets = [0, 0], sizes = [128, 8], strides = [1, 1]} : vector<128x128xf32> to vector<128x8xf32>
    %cst_27 = arith.constant 0.000000e+00 : f32
    %68 = vector.broadcast %cst_27 : f32 to vector<9x8xf32>
    %69 = vector.extract_strided_slice %67 {offsets = [0, 0], sizes = [119, 8], strides = [1, 1]} : vector<128x8xf32> to vector<119x8xf32>
    %70 = tpu.concatenate %68, %69 in 0 : vector<9x8xf32>, vector<119x8xf32> -> vector<128x8xf32>
    %cst_28 = arith.constant 0.000000e+00 : f32
    %71 = vector.broadcast %cst_28 : f32 to vector<8x8xf32>
    %72 = vector.extract_strided_slice %67 {offsets = [0, 0], sizes = [120, 8], strides = [1, 1]} : vector<128x8xf32> to vector<120x8xf32>
    %73 = tpu.concatenate %71, %72 in 0 : vector<8x8xf32>, vector<120x8xf32> -> vector<128x8xf32>
    %cst_29 = arith.constant 0.000000e+00 : f32
    %74 = vector.broadcast %cst_29 : f32 to vector<7x8xf32>
    %75 = vector.extract_strided_slice %67 {offsets = [0, 0], sizes = [121, 8], strides = [1, 1]} : vector<128x8xf32> to vector<121x8xf32>
    %76 = tpu.concatenate %74, %75 in 0 : vector<7x8xf32>, vector<121x8xf32> -> vector<128x8xf32>
    %cst_30 = arith.constant 0.000000e+00 : f32
    %77 = vector.broadcast %cst_30 : f32 to vector<1x8xf32>
    %78 = vector.extract_strided_slice %67 {offsets = [0, 0], sizes = [127, 8], strides = [1, 1]} : vector<128x8xf32> to vector<127x8xf32>
    %79 = tpu.concatenate %77, %78 in 0 : vector<1x8xf32>, vector<127x8xf32> -> vector<128x8xf32>
    %cst_31 = arith.constant 0.000000e+00 : f32
    %80 = vector.broadcast %cst_31 : f32 to vector<1x8xf32>
    %81 = vector.extract_strided_slice %67 {offsets = [1, 0], sizes = [127, 8], strides = [1, 1]} : vector<128x8xf32> to vector<127x8xf32>
    %82 = tpu.concatenate %81, %80 in 0 : vector<127x8xf32>, vector<1x8xf32> -> vector<128x8xf32>
    %cst_32 = arith.constant 0.000000e+00 : f32
    %83 = vector.broadcast %cst_32 : f32 to vector<7x8xf32>
    %84 = vector.extract_strided_slice %67 {offsets = [7, 0], sizes = [121, 8], strides = [1, 1]} : vector<128x8xf32> to vector<121x8xf32>
    %85 = tpu.concatenate %84, %83 in 0 : vector<121x8xf32>, vector<7x8xf32> -> vector<128x8xf32>
    %cst_33 = arith.constant 0.000000e+00 : f32
    %86 = vector.broadcast %cst_33 : f32 to vector<8x8xf32>
    %87 = vector.extract_strided_slice %67 {offsets = [8, 0], sizes = [120, 8], strides = [1, 1]} : vector<128x8xf32> to vector<120x8xf32>
    %88 = tpu.concatenate %87, %86 in 0 : vector<120x8xf32>, vector<8x8xf32> -> vector<128x8xf32>
    %cst_34 = arith.constant 0.000000e+00 : f32
    %89 = vector.broadcast %cst_34 : f32 to vector<9x8xf32>
    %90 = vector.extract_strided_slice %67 {offsets = [9, 0], sizes = [119, 8], strides = [1, 1]} : vector<128x8xf32> to vector<119x8xf32>
    %91 = tpu.concatenate %90, %89 in 0 : vector<119x8xf32>, vector<9x8xf32> -> vector<128x8xf32>
    %92 = tpu.concatenate %70, %73, %76, %79, %67, %82, %85, %88, %91 in 1 : vector<128x8xf32>, vector<128x8xf32>, vector<128x8xf32>, vector<128x8xf32>, vector<128x8xf32>, vector<128x8xf32>, vector<128x8xf32>, vector<128x8xf32>, vector<128x8xf32> -> vector<128x72xf32>
    %c0_35 = arith.constant 0 : index
    %c0_36 = arith.constant 0 : index
    %93 = vector.load %arg8[%c0_35, %c0_36] : memref<128x72xf32, #tpu.memory_space<vmem>>, vector<128x72xf32>
    %94 = arith.mulf %92, %93 : vector<128x72xf32>
    %c0_37 = arith.constant 0 : index
    %c0_38 = arith.constant 0 : index
    %95 = vector.load %arg4[%c0_37, %c0_38] : memref<72x128xf32, #tpu.memory_space<vmem>>, vector<72x128xf32>
    %cst_39 = arith.constant dense<0.000000e+00> : vector<128x128xf32>
    %96 = tpu.matmul %94, %95, %cst_39 {dimension_numbers = #tpu.dot_dimension_numbers<[1], [0], [0], [1], [0, 0, 1, 1], [], []>} : vector<128x72xf32>, vector<72x128xf32>, vector<128x128xf32> -> vector<128x128xf32>
    %cst_40 = arith.constant dense<0.000000e+00> : vector<8x128xf32>
    %97 = tpu.matmul %10, %96, %cst_40 {dimension_numbers = #tpu.dot_dimension_numbers<[1], [0], [0], [1], [0, 0, 1, 1], [], []>} : vector<8x128xf32>, vector<128x128xf32>, vector<8x128xf32> -> vector<8x128xf32>
    %98 = vector.extract_strided_slice %97 {offsets = [0, 0], sizes = [1, 128], strides = [1, 1]} : vector<8x128xf32> to vector<1x128xf32>
    %99 = arith.mulf %96, %96 : vector<128x128xf32>
    %cst_41 = arith.constant dense<0.000000e+00> : vector<8x128xf32>
    %100 = tpu.matmul %10, %99, %cst_41 {dimension_numbers = #tpu.dot_dimension_numbers<[1], [0], [0], [1], [0, 0, 1, 1], [], []>} : vector<8x128xf32>, vector<128x128xf32>, vector<8x128xf32> -> vector<8x128xf32>
    %101 = vector.extract_strided_slice %100 {offsets = [0, 0], sizes = [1, 128], strides = [1, 1]} : vector<8x128xf32> to vector<1x128xf32>
    %cst_42 = arith.constant 7.812500e-03 : f32
    %102 = vector.broadcast %cst_42 : f32 to vector<1x128xf32>
    %103 = arith.mulf %98, %102 : vector<1x128xf32>
    %cst_43 = arith.constant 7.812500e-03 : f32
    %104 = vector.broadcast %cst_43 : f32 to vector<1x128xf32>
    %105 = arith.mulf %101, %104 : vector<1x128xf32>
    %106 = arith.mulf %103, %103 : vector<1x128xf32>
    %107 = arith.subf %105, %106 : vector<1x128xf32>
    %cst_44 = arith.constant 0.000000e+00 : f32
    %108 = vector.broadcast %cst_44 : f32 to vector<1x128xf32>
    %109 = arith.maximumf %107, %108 : vector<1x128xf32>
    %c0_45 = arith.constant 0 : index
    %c0_46 = arith.constant 0 : index
    %110 = vector.load %arg5[%c0_45, %c0_46] : memref<1x128xf32, #tpu.memory_space<vmem>>, vector<1x128xf32>
    %cst_47 = arith.constant 9.99999974E-6 : f32
    %111 = vector.broadcast %cst_47 : f32 to vector<1x128xf32>
    %112 = arith.addf %109, %111 : vector<1x128xf32>
    %113 = math.rsqrt %112 : vector<1x128xf32>
    %114 = arith.mulf %110, %113 : vector<1x128xf32>
    %c0_48 = arith.constant 0 : index
    %c0_49 = arith.constant 0 : index
    %115 = vector.load %arg6[%c0_48, %c0_49] : memref<1x128xf32, #tpu.memory_space<vmem>>, vector<1x128xf32>
    %116 = arith.mulf %103, %114 : vector<1x128xf32>
    %117 = arith.subf %115, %116 : vector<1x128xf32>
    %118 = vector.broadcast %114 : vector<1x128xf32> to vector<128x128xf32>
    %119 = arith.mulf %96, %118 : vector<128x128xf32>
    %120 = vector.broadcast %117 : vector<1x128xf32> to vector<128x128xf32>
    %121 = arith.addf %119, %120 : vector<128x128xf32>
    %cst_50 = arith.constant 0.000000e+00 : f32
    %122 = vector.broadcast %cst_50 : f32 to vector<128x128xf32>
    %123 = arith.maximumf %121, %122 : vector<128x128xf32>
    %c0_51 = arith.constant 0 : index
    %c0_52 = arith.constant 0 : index
    %124 = vector.load %arg9[%c0_51, %c0_52] : memref<128x128xf32, #tpu.memory_space<vmem>>, vector<128x128xf32>
    tpu.vector_store %arg9[%c0_51, %c0_52], %123 {strides = array<i32>} : memref<128x128xf32, #tpu.memory_space<vmem>>, vector<128x128xf32>,
    return
  }
}

</mosaic_0001>

<bundles_post_ra>
// kernel: tpu_custom_call.1
= control target key start
LH: loop header
LB: loop body
LE: loop exit
PB: predicated region body
PF: predicated region fallthrough
CT: control target
= control target key end

     0   :  { %s2896_s25 = smov 124   ;;  %s4797_s0 = inlined_call_operand.vmem [shape: f32[16,2,8,8], index: 0, kind: input, shape index: {}]   ;;  %s4798_s1 = inlined_call_operand.vmem [shape: f32[36,128], index: 1, kind: input, shape index: {}]   ;;  %s4799_s2 = inlined_call_operand.vmem [shape: f32[1,128], index: 2, kind: input, shape index: {}]   ;;  %s4800_s3 = inlined_call_operand.vmem [shape: f32[1,128], index: 3, kind: input, shape index: {}]   ;;  %s4801_s4 = inlined_call_operand.vmem [shape: f32[72,128], index: 4, kind: input, shape index: {}]   ;;  %s4802_s5 = inlined_call_operand.vmem [shape: f32[1,128], index: 5, kind: input, shape index: {}]   ;;  %s4803_s6 = inlined_call_operand.vmem [shape: f32[1,128], index: 6, kind: input, shape index: {}]   ;;  %s4804_s7 = inlined_call_operand.vmem [shape: f32[128,36], index: 7, kind: input, shape index: {}]   ;;  %s4805_s8 = inlined_call_operand.vmem [shape: f32[128,72], index: 8, kind: input, shape index: {}]   ;;  %s4806_s9 = inlined_call_operand.hbm [shape: f32[128,128], index: 9, kind: output, shape index: {}]  }
   0x1   :  { %v33_v0 = vld [vmem:[%s4797_s0] sm:$0xff]  ;;  %v34_v1 = vld [vmem:[%s4797_s0 + $0x8] sm:$0xff]  ;;  %v35_v5 = vld [vmem:[%s4797_s0 + $0x10] sm:$0xff] }
   0x2   :  { %v37_v2 = vld [vmem:[%s4797_s0 + $0x20] sm:$0xff]  ;;  %v2974_v3 = vmax.f32 %v33_v0, %v34_v1  ;;  %v38_v4 = vld [vmem:[%s4797_s0 + $0x28] sm:$0xff]  ;;  %v36_v6 = vld [vmem:[%s4797_s0 + $0x18] sm:$0xff] }
   0x3   :  { %v2985_v7 = vmax.f32 %v37_v2, %v38_v4  ;;  %v39_v8 = vld [vmem:[%s4797_s0 + $0x30] sm:$0xff]  ;;  %v40_v9 = vld [vmem:[%s4797_s0 + $0x38] sm:$0xff]  ;;  %v2995_v10 = vmax.f32 %v35_v5, %v36_v6  ;;  %v41_v12 = vld [vmem:[%s4797_s0 + $0x40] sm:$0xff] }
   0x4   :  { %97 = vrot.lane.b32.xlu0 %v2974_v3, %s2896_s25  ;;  %v2999_v11 = vmax.f32 %v39_v8, %v40_v9  ;;  %v42_v13 = vld [vmem:[%s4797_s0 + $0x48] sm:$0xff]  ;;  %v43_v14 = vld [vmem:[%s4797_s0 + $0x50] sm:$0xff]  ;;  %v44_v15 = vld [vmem:[%s4797_s0 + $0x58] sm:$0xff] }
   0x5   :  { %101 = vrot.lane.b32.xlu1 %v2985_v7, %s2896_s25  ;;  %v3015_v16 = vmax.f32 %v41_v12, %v42_v13  ;;  %v3019_v17 = vmax.f32 %v43_v14, %v44_v15  ;;  %v45_v18 = vld [vmem:[%s4797_s0 + $0x60] sm:$0xff]  ;;  %v46_v19 = vld [vmem:[%s4797_s0 + $0x68] sm:$0xff]  ;;  %v47_v20 = vld [vmem:[%s4797_s0 + $0x70] sm:$0xff] }
   0x6   :  { %v48_v21 = vld [vmem:[%s4797_s0 + $0x78] sm:$0xff] }
   0x8   :  { %99 = vrot.lane.b32.xlu0 %v2995_v10, %s2896_s25 }
   0x9   :  { %103 = vrot.lane.b32.xlu1 %v2999_v11, %s2896_s25 }
   0xa   :  { %14 = vsyncpa [#allocation3], 0  ;;  %v3035_v22 = vmax.f32 %v45_v18, %v46_v19  ;;  %v3039_v23 = vmax.f32 %v47_v20, %v48_v21  ;;  %v49_v24 = vld [vmem:[%s4797_s0 + $0x80] sm:$0xff]  ;;  %v50_v25 = vld [vmem:[%s4797_s0 + $0x88] sm:$0xff]  ;;  %v4811_v48 = vmov 0.0   ;;  %s2898_s13 = smov 4  }
   0xb   :  { %v51_v26 = vld [vmem:[%s4797_s0 + $0x90] sm:$0xff]  ;;  %v52_v27 = vld [vmem:[%s4797_s0 + $0x98] sm:$0xff]  ;;  %v3055_v28 = vmax.f32 %v49_v24, %v50_v25  ;;  %v53_v30 = vld [vmem:[%s4797_s0 + $0xa0] sm:$0xff]  ;;  %vm223_vm0 = vcmask 1046528   ;;  %s2901_s14 = smov 8   ;;  %vm176_vm1 = vcmask 1040384  }
   0xc   :  { %105 = vrot.lane.b32.xlu0 %v3015_v16, %s2896_s25  ;;  %v3059_v29 = vmax.f32 %v51_v26, %v52_v27  ;;  %v54_v31 = vld [vmem:[%s4797_s0 + $0xa8] sm:$0xff]  ;;  %v55_v32 = vld [vmem:[%s4797_s0 + $0xb0] sm:$0xff]  ;;  %v56_v33 = vld [vmem:[%s4797_s0 + $0xb8] sm:$0xff]  ;;  %s2902_s15 = smov 12   ;;  %s2903_s20 = smov 20   ;;  %vm874_vm2 = vcmask 1043456  }
   0xd   :  { %107 = vrot.lane.b32.xlu1 %v3019_v17, %s2896_s25  ;;  %v3075_v34 = vmax.f32 %v53_v30, %v54_v31  ;;  %v3079_v35 = vmax.f32 %v55_v32, %v56_v33  ;;  %v57_v36 = vld [vmem:[%s4797_s0 + $0xc0] sm:$0xff]  ;;  %v58_v37 = vld [vmem:[%s4797_s0 + $0xc8] sm:$0xff]  ;;  %v59_v38 = vld [vmem:[%s4797_s0 + $0xd0] sm:$0xff]  ;;  %s2904_s26 = smov 24   ;;  %s2905_s29 = smov 32   ;;  %vm652_vm3 = vcmask 31744  }
   0xe   :  { %v60_v39 = vld [vmem:[%s4797_s0 + $0xd8] sm:$0xff]  ;;  %v3095_v40 = vmax.f32 %v57_v36, %v58_v37  ;;  %v61_v42 = vld [vmem:[%s4797_s0 + $0xe0] sm:$0xff]  ;;  %v62_v43 = vld [vmem:[%s4797_s0 + $0xe8] sm:$0xff]  ;;  %vm669_vm4 = vcmask 64512   ;;  %vm686_vm5 = vcmask 97280   ;;  %vm703_vm6 = vcmask 130048  }
   0xf   :  { %v3099_v41 = vmax.f32 %v59_v38, %v60_v39  ;;  %v63_v44 = vld [vmem:[%s4797_s0 + $0xf0] sm:$0xff]  ;;  %v64_v45 = vld [vmem:[%s4797_s0 + $0xf8] sm:$0xff]  ;;  %v3115_v46 = vmax.f32 %v61_v42, %v62_v43  ;;  %s2899_s0 = smov 16   ;;  %v820_v6 = vld [vmem:[%s4798_s1] sm:$0xff]  ;;  %vm720_vm7 = vcmask 162816   ;;  %vm737_vm8 = vcmask 195584  }
  0x10   :  { %109 = vrot.lane.b32.xlu0 %v3035_v22, %s2896_s25  ;;  %v3119_v47 = vmax.f32 %v63_v44, %v64_v45  ;;  %v823_v12 = vld [vmem:[%s4798_s1 + $0x18] sm:$0xff]  ;;  %v824_v18 = vld [vmem:[%s4798_s1 + $0x20] sm:$0xf]  ;;  %vm754_vm9 = vcmask 228352   ;;  %vm771_vm10 = vcmask 261120   ;;  %vm825_vm11 = vcmask 293888  }
  0x11   :  { %111 = vrot.lane.b32.xlu1 %v3039_v23, %s2896_s25  ;;  %vm2907_vm12 = vmmov 0   ;;  %s2910_s18 = smov 40   ;;  %vm1803_vm13 = vcmask 326656   ;;  %vm1820_vm14 = vcmask 392192   ;;  %vm1837_vm15 = vcmask 457728  }
  0x12   :  { %2579 = vmatprep.mubr.msk.f32.mxu1 %vm2907_vm12, %v4811_v48 }
  0x14   :  { %113 = vrot.lane.b32.xlu0 %v3055_v28, %s2896_s25 }
  0x15   :  { %115 = vrot.lane.b32.xlu1 %v3059_v29, %s2896_s25 }
  0x18   :  { %117 = vrot.lane.b32.xlu0 %v3075_v34, %s2896_s25 }
  0x19   :  { %119 = vrot.lane.b32.xlu1 %v3079_v35, %s2896_s25 }
  0x1c   :  { %121 = vrot.lane.b32.xlu0 %v3095_v40, %s2896_s25 }
  0x1d   :  { %123 = vrot.lane.b32.xlu1 %v3099_v41, %s2896_s25 }
  0x20   :  { %125 = vrot.lane.b32.xlu0 %v3115_v46, %s2896_s25 }
  0x21   :  { %127 = vrot.lane.b32.xlu1 %v3119_v47, %s2896_s25  ;;  %s2900_s25 = smov 28  }
  0x24   :  { %264 = vrot.lane.b32.xlu0 %v4811_v48, %s2898_s13 }
  0x76   :  { %v98_v49 = vpop.permute.xlu0 %97 }
  0x77   :  { %v145_v50 = vmax.f32 %v2974_v3, %v98_v49  ;;  %v102_v53 = vpop.permute.xlu1 %101 }
  0x78   :  { %v3138_v54 = vmax.f32 %v2985_v7, %v102_v53  ;;  %v821_v7 = vld [vmem:[%s4798_s1 + $0x8] sm:$0xff] }
  0x79   :  { %410 = vrot.lane.b32.xlu0 %v145_v50, %s2899_s0  ;;  %266 = vrot.lane.b32.xlu1 %v145_v50, %s2898_s13  ;;  %v224_v63 = vrot.slane %v145_v50, 1  ;;  %v177_v3 = vrot.slane %v145_v50, 7 }
  0x7a   :  { %v100_v51 = vpop.permute.xlu0 %99  ;;  %v227_v9 = vrot.slane %v3138_v54, 1 }
  0x7b   :  { %v3131_v52 = vmax.f32 %v2995_v10, %v100_v51  ;;  %v104_v55 = vpop.permute.xlu1 %103  ;;  %v256_v5 = vsel %vm223_vm0, 0.0, %v224_v63  ;;  %v3196_v8 = vsel %vm176_vm1, 0.0, %v177_v3  ;;  %v2729_v10 = vpack.c.bf16 %v821_v7, %v820_v6 }
  0x7c   :  { %v3149_v56 = vmax.f32 %v2999_v11, %v104_v55  ;;  %v822_v11 = vld [vmem:[%s4798_s1 + $0x10] sm:$0xff] }
  0x7d   :  { %412 = vrot.lane.b32.xlu0 %v3131_v52, %s2899_s0  ;;  %268 = vrot.lane.b32.xlu1 %v3131_v52, %s2898_s13  ;;  %v225_v62 = vrot.slane %v3131_v52, 1  ;;  %v178_v2 = vrot.slane %v3131_v52, 7  ;;  %v2733_v15 = vpack.c.bf16 %v823_v12, %v822_v11 }
  0x7e   :  { %v106_v57 = vpop.permute.xlu0 %105  ;;  %2730 = vmatprep.subr.bf16.mxu0 %v2729_v10  ;;  %v229_v14 = vrot.slane %v3149_v56, 1  ;;  %v182_v20 = vrot.slane %v3149_v56, 7 }
  0x7f   :  { %v3156_v58 = vmax.f32 %v3015_v16, %v106_v57  ;;  %v108_v59 = vpop.permute.xlu1 %107  ;;  %v226_v1 = vsel %vm223_vm0, %v224_v63, %v225_v62  ;;  %v3183_v4 = vsel %vm176_vm1, %v177_v3, %v178_v2  ;;  %2732 = vmatpush3.bf16.msra.mxu0 %v2729_v10  ;;  %v228_v13 = vsel %vm223_vm0, %v225_v62, %v227_v9 }
  0x80   :  { %v3167_v60 = vmax.f32 %v3019_v17, %v108_v59  ;;  %2734 = vmatprep.subr.bf16.mxu0 %v2733_v15  ;;  %v230_v16 = vsel %vm223_vm0, %v227_v9, %v229_v14  ;;  %v180_v17 = vrot.slane %v3138_v54, 7 }
  0x81   :  { %270 = vrot.lane.b32.xlu0 %v3138_v54, %s2898_s13  ;;  %556 = vrot.lane.b32.xlu1 %v3131_v52, %s2900_s25  ;;  %v184_v27 = vrot.slane %v3156_v58, 7 }
  0x82   :  { %v110_v61 = vpop.permute.xlu0 %109  ;;  %v3221_v19 = vsel %vm176_vm1, %v178_v2, %v180_v17  ;;  %v3229_v21 = vsel %vm176_vm1, %v180_v17, %v182_v20  ;;  %v233_v25 = vrot.slane %v3167_v60, 1  ;;  %v186_v31 = vrot.slane %v3167_v60, 7 }
  0x83   :  { %v3175_v0 = vmax.f32 %v3035_v22, %v110_v61  ;;  %2736 = vmatpush3.bf16.msra.mxu0 %v2733_v15  ;;  %v231_v22 = vrot.slane %v3156_v58, 1  ;;  %v3247_v30 = vsel %vm176_vm1, %v182_v20, %v184_v27  ;;  %v112_v33 = vpop.permute.xlu1 %111 }
  0x84   :  { %2521 = vmatprep.subr.msk.mxu0 %vm874_vm2, %v824_v18  ;;  %v3255_v32 = vsel %vm176_vm1, %v184_v27, %v186_v31  ;;  %v152_v36 = vmax.f32 %v3039_v23, %v112_v33 }
  0x85   :  { %558 = vrot.lane.b32.xlu0 %v3138_v54, %s2900_s25  ;;  %414 = vrot.lane.b32.xlu1 %v3138_v54, %s2899_s0  ;;  %v232_v24 = vsel %vm223_vm0, %v229_v14, %v231_v22  ;;  %v234_v26 = vsel %vm223_vm0, %v231_v22, %v233_v25  ;;  %v235_v37 = vrot.slane %v3175_v0, 1  ;;  %v188_v44 = vrot.slane %v3175_v0, 7 }
  0x86   :  { %v237_v39 = vrot.slane %v152_v36, 1  ;;  %v114_v42 = vpop.permute.xlu0 %113  ;;  %v190_v50 = vrot.slane %v152_v36, 7 }
  0x87   :  { %2522 = vmatpush3.msk.msra.mxu0 %vm874_vm2, %v824_v18  ;;  %v236_v38 = vsel %vm223_vm0, %v233_v25, %v235_v37  ;;  %v116_v23 = vpop.permute.xlu1 %115  ;;  %v3273_v49 = vsel %vm176_vm1, %v186_v31, %v188_v44  ;;  %vm1854_vm2 = vcmask 523264  }
  0x88   :  { %v238_v43 = vsel %vm223_vm0, %v235_v37, %v237_v39  ;;  %v3280_v51 = vsel %vm176_vm1, %v188_v44, %v190_v50  ;;  %v3306_v59 = vmax.f32 %v3059_v29, %v116_v23 }
  0x89   :  { %272 = vrot.lane.b32.xlu0 %v3149_v56, %s2898_s13  ;;  %416 = vrot.lane.b32.xlu1 %v3149_v56, %s2899_s0 }
  0x8a   :  { %v118_v45 = vpop.permute.xlu0 %117  ;;  %v241_v63 = vrot.slane %v3306_v59, 1  ;;  %v194_v7 = vrot.slane %v3306_v59, 7 }
  0x8b   :  { %v120_v52 = vpop.permute.xlu1 %119  ;;  %v155_v18 = vmax.f32 %v3075_v34, %v118_v45 }
  0x8d   :  { %560 = vrot.lane.b32.xlu1 %v3149_v56, %s2900_s25  ;;  %274 = vrot.lane.b32.xlu0 %v3156_v58, %s2898_s13  ;;  %v153_v56 = vmax.f32 %v3055_v28, %v114_v42  ;;  %v243_v25 = vrot.slane %v155_v18, 1  ;;  %v196_v37 = vrot.slane %v155_v18, 7 }
  0x8e   :  { %v3286_v53 = vpop.permute.xlu0 %121 }
  0x8f   :  { %v3292_v54 = vpop.permute.xlu1 %123  ;;  %v192_v2 = vrot.slane %v153_v56, 7  ;;  %v244_v34 = vsel %vm223_vm0, %v241_v63, %v243_v25  ;;  %v3391_v42 = vsel %vm176_vm1, %v194_v7, %v196_v37 }
  0x91   :  { %418 = vrot.lane.b32.xlu1 %v3156_v58, %s2899_s0  ;;  %562 = vrot.lane.b32.xlu0 %v3156_v58, %s2900_s25  ;;  %v3331_v6 = vsel %vm176_vm1, %v190_v50, %v192_v2  ;;  %v3343_v11 = vsel %vm176_vm1, %v192_v2, %v194_v7 }
  0x92   :  { %v3294_v55 = vpop.permute.xlu0 %125 }
  0x93   :  { %v3301_v57 = vpop.permute.xlu1 %127 }
  0x95   :  { %420 = vrot.lane.b32.xlu1 %v3167_v60, %s2899_s0  ;;  %276 = vrot.lane.b32.xlu0 %v3167_v60, %s2898_s13 }
  0x96   :  { %v3303_v58 = vpop.permute.xlu0 %264 }
  0x97   :  { %v653_v44 = vsel %vm652_vm3, 0.0, %v3303_v58 }
  0x99   :  { %315 = vrot.lane.b32.xlu1 %v226_v1, %s2901_s14  ;;  %278 = vrot.lane.b32.xlu0 %v3175_v0, %s2898_s13 }
  0x9d   :  { %364 = vrot.lane.b32.xlu1 %v3183_v4, %s2902_s15  ;;  %313 = vrot.lane.b32.xlu0 %v256_v5, %s2901_s14 }
  0xa1   :  { %459 = vrot.lane.b32.xlu1 %v226_v1, %s2903_s20  ;;  %362 = vrot.lane.b32.xlu0 %v3196_v8, %s2902_s15 }
  0xa5   :  { %317 = vrot.lane.b32.xlu1 %v228_v13, %s2901_s14  ;;  %461 = vrot.lane.b32.xlu0 %v228_v13, %s2903_s20 }
  0xa9   :  { %508 = vrot.lane.b32.xlu1 %v3183_v4, %s2904_s26  ;;  %319 = vrot.lane.b32.xlu0 %v230_v16, %s2901_s14 }
  0xad   :  { %366 = vrot.lane.b32.xlu1 %v3221_v19, %s2902_s15  ;;  %510 = vrot.lane.b32.xlu0 %v3221_v19, %s2904_s26 }
  0xb1   :  { %604 = vrot.lane.b32.xlu1 %v228_v13, %s2905_s29  ;;  %368 = vrot.lane.b32.xlu0 %v3229_v21, %s2902_s15 }
  0xb5   :  { %606 = vrot.lane.b32.xlu1 %v230_v16, %s2905_s29  ;;  %463 = vrot.lane.b32.xlu0 %v230_v16, %s2903_s20 }
  0xb9   :  { %321 = vrot.lane.b32.xlu1 %v232_v24, %s2901_s14  ;;  %465 = vrot.lane.b32.xlu0 %v232_v24, %s2903_s20 }
  0xbd   :  { %512 = vrot.lane.b32.xlu1 %v3229_v21, %s2904_s26  ;;  %323 = vrot.lane.b32.xlu0 %v234_v26, %s2901_s14 }
  0xc1   :  { %370 = vrot.lane.b32.xlu1 %v3247_v30, %s2902_s15  ;;  %514 = vrot.lane.b32.xlu0 %v3247_v30, %s2904_s26 }
  0xc5   :  { %608 = vrot.lane.b32.xlu1 %v232_v24, %s2905_s29  ;;  %372 = vrot.lane.b32.xlu0 %v3255_v32, %s2902_s15  ;;  %v3374_v24 = vmax.f32 %v3079_v35, %v120_v52 }
  0xc7   :  { %v245_v31 = vrot.slane %v3374_v24, 1 }
  0xc9   :  { %610 = vrot.lane.b32.xlu1 %v234_v26, %s2905_s29  ;;  %467 = vrot.lane.b32.xlu0 %v234_v26, %s2903_s20  ;;  %v246_v35 = vsel %vm223_vm0, %v243_v25, %v245_v31 }
  0xcd   :  { %469 = vrot.lane.b32.xlu0 %v236_v38, %s2903_s20  ;;  %325 = vrot.lane.b32.xlu1 %v236_v38, %s2901_s14 }
  0xd1   :  { %327 = vrot.lane.b32.xlu0 %v238_v43, %s2901_s14  ;;  %516 = vrot.lane.b32.xlu1 %v3255_v32, %s2904_s26 }
  0xd5   :  { %518 = vrot.lane.b32.xlu0 %v3273_v49, %s2904_s26  ;;  %374 = vrot.lane.b32.xlu1 %v3273_v49, %s2902_s15 }
  0xd9   :  { %376 = vrot.lane.b32.xlu0 %v3280_v51, %s2902_s15  ;;  %564 = vrot.lane.b32.xlu1 %v3167_v60, %s2900_s25  ;;  %v239_v60 = vrot.slane %v153_v56, 1 }
  0xdb   :  { %v240_v28 = vsel %vm223_vm0, %v237_v39, %v239_v60  ;;  %v242_v1 = vsel %vm223_vm0, %v239_v60, %v241_v63 }
  0xdd   :  { %566 = vrot.lane.b32.xlu0 %v3175_v0, %s2900_s25  ;;  %422 = vrot.lane.b32.xlu1 %v3175_v0, %s2899_s0 }
  0xe1   :  { %280 = vrot.lane.b32.xlu0 %v152_v36, %s2898_s13  ;;  %612 = vrot.lane.b32.xlu1 %v236_v38, %s2905_s29 }
  0xe5   :  { %471 = vrot.lane.b32.xlu0 %v238_v43, %s2903_s20  ;;  %424 = vrot.lane.b32.xlu1 %v152_v36, %s2899_s0 }
  0xe9   :  { %614 = vrot.lane.b32.xlu1 %v238_v43, %s2905_s29  ;;  %282 = vrot.lane.b32.xlu0 %v153_v56, %s2898_s13  ;;  %v198_v43 = vrot.slane %v3374_v24, 7 }
  0xeb   :  { %v3310_v61 = vpop.permute.xlu1 %266  ;;  %v3312_v62 = vpop.permute.xlu0 %410  ;;  %v3404_v52 = vsel %vm176_vm1, %v196_v37, %v198_v43  ;;  %v3435_v37 = vmax.f32 %v3095_v40, %v3286_v53 }
  0xec   :  { %v654_v63 = vsel %vm652_vm3, %v3196_v8, %v3310_v61  ;;  %v788_v61 = vld [vmem:[%s4804_s7] sm:$0xff] }
  0xed   :  { %473 = vrot.lane.b32.xlu0 %v240_v28, %s2903_s20  ;;  %329 = vrot.lane.b32.xlu1 %v240_v28, %s2901_s14 }
  0xef   :  { %v3318_v0 = vpop.permute.xlu1 %268  ;;  %v3320_v29 = vpop.permute.xlu0 %412 }
  0xf1   :  { %331 = vrot.lane.b32.xlu0 %v242_v1, %s2901_s14  ;;  %520 = vrot.lane.b32.xlu1 %v3280_v51, %s2904_s26 }
  0xf3   :  { %v3326_v3 = vpop.permute.xlu1 %556  ;;  %v3328_v5 = vpop.permute.xlu0 %270 }
  0xf5   :  { %522 = vrot.lane.b32.xlu0 %v3331_v6, %s2904_s26  ;;  %378 = vrot.lane.b32.xlu1 %v3331_v6, %s2902_s15 }
  0xf7   :  { %v3338_v9 = vpop.permute.xlu1 %414  ;;  %v3340_v10 = vpop.permute.xlu0 %558 }
  0xf9   :  { %380 = vrot.lane.b32.xlu0 %v3343_v11, %s2902_s15  ;;  %568 = vrot.lane.b32.xlu1 %v152_v36, %s2900_s25 }
  0xfb   :  { %v3348_v12 = vpop.permute.xlu1 %416  ;;  %v3350_v13 = vpop.permute.xlu0 %272 }
  0xfd   :  { %570 = vrot.lane.b32.xlu0 %v153_v56, %s2900_s25  ;;  %426 = vrot.lane.b32.xlu1 %v153_v56, %s2899_s0 }
  0xff   :  { %v3354_v14 = vpop.permute.xlu1 %560  ;;  %v3356_v15 = vpop.permute.xlu0 %274 }
 0x101   :  { %284 = vrot.lane.b32.xlu0 %v3306_v59, %s2898_s13  ;;  %616 = vrot.lane.b32.xlu1 %v240_v28, %s2905_s29 }
 0x103   :  { %v3361_v16 = vpop.permute.xlu1 %418  ;;  %v3363_v17 = vpop.permute.xlu0 %562 }
 0x105   :  { %475 = vrot.lane.b32.xlu0 %v242_v1, %s2903_s20  ;;  %428 = vrot.lane.b32.xlu1 %v3306_v59, %s2899_s0 }
 0x107   :  { %v3369_v20 = vpop.permute.xlu1 %420  ;;  %v3371_v22 = vpop.permute.xlu0 %276 }
 0x109   :  { %618 = vrot.lane.b32.xlu1 %v242_v1, %s2905_s29  ;;  %286 = vrot.lane.b32.xlu0 %v155_v18, %s2898_s13 }
 0x10b   :  { %v316_v26 = vpop.permute.xlu1 %315  ;;  %v3378_v27 = vpop.permute.xlu0 %278 }
 0x10c   :  { %v671_v1 = vsel %vm669_vm4, %v654_v63, %v316_v26 }
 0x10d   :  { %477 = vrot.lane.b32.xlu0 %v244_v34, %s2903_s20  ;;  %333 = vrot.lane.b32.xlu1 %v244_v34, %s2901_s14 }
 0x10f   :  { %v365_v33 = vpop.permute.xlu1 %364  ;;  %v314_v36 = vpop.permute.xlu0 %313 }
 0x110   :  { %v670_v50 = vsel %vm669_vm4, %v653_v44, %v314_v36  ;;  %v3450_v44 = vmax.f32 %v3099_v41, %v3292_v54 }
 0x111   :  { %335 = vrot.lane.b32.xlu0 %v246_v35, %s2901_s14  ;;  %524 = vrot.lane.b32.xlu1 %v3343_v11, %s2904_s26 }
 0x112   :  { %v249_v54 = vrot.slane %v3450_v44, 1 }
 0x113   :  { %v460_v38 = vpop.permute.xlu1 %459  ;;  %v363_v39 = vpop.permute.xlu0 %362 }
 0x114   :  { %v687_v56 = vsel %vm686_vm5, %v670_v50, %v363_v39  ;;  %v247_v50 = vrot.slane %v3435_v37, 1 }
 0x115   :  { %526 = vrot.lane.b32.xlu0 %v3391_v42, %s2904_s26  ;;  %382 = vrot.lane.b32.xlu1 %v3391_v42, %s2902_s15  ;;  %v704_v28 = vsel %vm703_vm6, %v687_v56, %v3312_v62 }
 0x116   :  { %v721_v2 = vsel %vm720_vm7, %v704_v28, %v460_v38  ;;  %v248_v41 = vsel %vm223_vm0, %v245_v31, %v247_v50  ;;  %v655_v28 = vsel %vm652_vm3, %v3183_v4, %v3318_v0  ;;  %v250_v31 = vsel %vm223_vm0, %v247_v50, %v249_v54 }
 0x117   :  { %v318_v23 = vpop.permute.xlu1 %317  ;;  %v462_v45 = vpop.permute.xlu0 %461  ;;  %v656_v4 = vsel %vm652_vm3, %v3221_v19, %v3328_v5  ;;  %v202_v5 = vrot.slane %v3450_v44, 7 }
 0x119   :  { %384 = vrot.lane.b32.xlu0 %v3404_v52, %s2902_s15  ;;  %572 = vrot.lane.b32.xlu1 %v3306_v59, %s2900_s25  ;;  %v688_v59 = vsel %vm686_vm5, %v671_v1, %v365_v33 }
 0x11a   :  { %v705_v8 = vsel %vm703_vm6, %v688_v59, %v3320_v29 }
 0x11b   :  { %v509_v58 = vpop.permute.xlu1 %508  ;;  %v320_v60 = vpop.permute.xlu0 %319 }
 0x11c   :  { %v738_v62 = vsel %vm737_vm8, %v721_v2, %v509_v58  ;;  %v200_v2 = vrot.slane %v3435_v37, 7  ;;  %v673_v0 = vsel %vm669_vm4, %v656_v4, %v320_v60  ;;  %v790_v60 = vld [vmem:[%s4804_s7 + $0x10] sm:$0xff] }
 0x11d   :  { %574 = vrot.lane.b32.xlu0 %v155_v18, %s2900_s25  ;;  %430 = vrot.lane.b32.xlu1 %v155_v18, %s2899_s0  ;;  %v722_v18 = vsel %vm720_vm7, %v705_v8, %v462_v45  ;;  %v755_v33 = vsel %vm754_vm9, %v738_v62, %v3326_v3  ;;  %v789_v3 = vld [vmem:[%s4804_s7 + $0x8] sm:$0xff] }
 0x11e   :  { %v3492_v19 = vsel %vm176_vm1, %v198_v43, %v200_v2 }
 0x11f   :  { %v367_v7 = vpop.permute.xlu1 %366  ;;  %v511_v25 = vpop.permute.xlu0 %510 }
 0x121   :  { %288 = vrot.lane.b32.xlu0 %v3374_v24, %s2898_s13  ;;  %620 = vrot.lane.b32.xlu1 %v244_v34, %s2905_s29  ;;  %v739_v34 = vsel %vm737_vm8, %v722_v18, %v511_v25 }
 0x122   :  { %v756_v40 = vsel %vm754_vm9, %v739_v34, %v3340_v10 }
 0x123   :  { %v605_v26 = vpop.permute.xlu1 %604  ;;  %v369_v36 = vpop.permute.xlu0 %368 }
 0x124   :  { %v772_v38 = vsel %vm771_vm10, %v755_v33, %v605_v26 }
 0x125   :  { %479 = vrot.lane.b32.xlu0 %v246_v35, %s2903_s20  ;;  %432 = vrot.lane.b32.xlu1 %v3374_v24, %s2899_s0  ;;  %v804_v29 = vmul.f32 %v788_v61, %v772_v38  ;;  %v3512_v38 = vsel %vm176_vm1, %v200_v2, %v202_v5 }
 0x127   :  { %v607_v39 = vpop.permute.xlu1 %606  ;;  %2523 = vmatprep.mubr.msk.f32.mxu0 %vm825_vm11, %v804_v29  ;;  %v464_v53 = vpop.permute.xlu0 %463 }
 0x128   :  { %v773_v45 = vsel %vm771_vm10, %v756_v40, %v607_v39 }
 0x129   :  { %v805_v56 = vmul.f32 %v789_v3, %v773_v45  ;;  %622 = vrot.lane.b32.xlu1 %v246_v35, %s2905_s29  ;;  %290 = vrot.lane.b32.xlu0 %v3435_v37, %s2898_s13  ;;  %v672_v35 = vsel %vm669_vm4, %v655_v28, %v318_v23 }
 0x12a   :  { %v689_v63 = vsel %vm686_vm5, %v672_v35, %v367_v7  ;;  %v690_v7 = vsel %vm686_vm5, %v673_v0, %v369_v36  ;;  %v792_v0 = vld [vmem:[%s4804_s7 + $0x20] sm:$0xff] }
 0x12b   :  { %v3457_v58 = vpop.permute.xlu1 %321  ;;  %2524 = vmatmul.mubr.msk.f32.vlgmr.msra.gmra.mrb[0].mxu0 %vm825_vm11, %v805_v56  ;;  %v466_v10 = vpop.permute.xlu0 %465  ;;  %v706_v23 = vsel %vm703_vm6, %v689_v63, %v3338_v9  ;;  %v707_v9 = vsel %vm703_vm6, %v690_v7, %v3348_v12  ;;  %v159_v56 = vmax.f32 %v3115_v46, %v3294_v55  ;;  %v657_v46 = vsel %vm652_vm3, %v3229_v21, %v3350_v13 }
 0x12c   :  { %v723_v25 = vsel %vm720_vm7, %v706_v23, %v464_v53  ;;  %v724_v18 = vsel %vm720_vm7, %v707_v9, %v466_v10  ;;  %v674_v63 = vsel %vm669_vm4, %v657_v46, %v3457_v58 }
 0x12d   :  { %481 = vrot.lane.b32.xlu0 %v248_v41, %s2903_s20  ;;  %337 = vrot.lane.b32.xlu1 %v248_v41, %s2901_s14  ;;  %v251_v28 = vrot.slane %v159_v56, 1  ;;  %v204_v2 = vrot.slane %v159_v56, 7 }
 0x12f   :  { %v513_v1 = vpop.permute.xlu1 %512  ;;  %v3471_v59 = vpop.permute.xlu0 %323 }
 0x130   :  { %v740_v61 = vsel %vm737_vm8, %v723_v25, %v513_v1 }
 0x131   :  { %339 = vrot.lane.b32.xlu0 %v250_v31, %s2901_s14  ;;  %528 = vrot.lane.b32.xlu1 %v3404_v52, %s2904_s26  ;;  %v757_v43 = vsel %vm754_vm9, %v740_v61, %v3354_v14  ;;  %v791_v14 = vld [vmem:[%s4804_s7 + $0x18] sm:$0xff]  ;;  %v3589_v61 = vsel %vm176_vm1, %v202_v5, %v204_v2 }
 0x133   :  { %v371_v62 = vpop.permute.xlu1 %370  ;;  %v515_v8 = vpop.permute.xlu0 %514 }
 0x134   :  { %v741_v36 = vsel %vm737_vm8, %v724_v18, %v515_v8  ;;  %v691_v1 = vsel %vm686_vm5, %v674_v63, %v371_v62 }
 0x135   :  { %386 = vrot.lane.b32.xlu1 %v3492_v19, %s2902_s15  ;;  %530 = vrot.lane.b32.xlu0 %v3492_v19, %s2904_s26  ;;  %v758_v3 = vsel %vm754_vm9, %v741_v36, %v3363_v17  ;;  %v708_v13 = vsel %vm703_vm6, %v691_v1, %v3361_v16  ;;  %v658_v16 = vsel %vm652_vm3, %v3247_v30, %v3356_v15 }
 0x136   :  { %v675_v62 = vsel %vm669_vm4, %v658_v16, %v3471_v59  ;;  %v795_v16 = vld [vmem:[%s4804_s7 + $0x38] sm:$0xff] }
 0x137   :  { %v609_v26 = vpop.permute.xlu1 %608  ;;  %v373_v33 = vpop.permute.xlu0 %372 }
 0x138   :  { %v774_v34 = vsel %vm771_vm10, %v757_v43, %v609_v26 }
 0x139   :  { %v806_v12 = vmul.f32 %v790_v60, %v774_v34  ;;  %576 = vrot.lane.b32.xlu1 %v3374_v24, %s2900_s25  ;;  %388 = vrot.lane.b32.xlu0 %v3512_v38, %s2902_s15  ;;  %v692_v60 = vsel %vm686_vm5, %v675_v62, %v373_v33  ;;  %v793_v33 = vld [vmem:[%s4804_s7 + $0x28] sm:$0xff] }
 0x13a   :  { %v709_v18 = vsel %vm703_vm6, %v692_v60, %v3369_v20  ;;  %v4809_v60 = vmov 0.0|0.0  }
 0x13b   :  { %v611_v29 = vpop.permute.xlu1 %610  ;;  %2526 = vmatprep.mubr.msk.f32.mxu0 %vm825_vm11, %v806_v12  ;;  %v468_v39 = vpop.permute.xlu0 %467  ;;  %2737 = vmatprep.subr.bf16.mxu1 %v4809_v60 }
 0x13c   :  { %v775_v40 = vsel %vm771_vm10, %v758_v3, %v611_v29  ;;  %v725_v4 = vsel %vm720_vm7, %v708_v13, %v468_v39  ;;  %2761 = vmatprep.subr.bf16.mxu0 %v4809_v60 }
 0x13d   :  { %v807_v53 = vmul.f32 %v791_v14, %v775_v40  ;;  %434 = vrot.lane.b32.xlu1 %v3435_v37, %s2899_s0  ;;  %578 = vrot.lane.b32.xlu0 %v3435_v37, %s2900_s25 }
 0x13f   :  { %v3529_v24 = vpop.permute.xlu1 %325  ;;  %2527 = vmatmul.mubr.msk.f32.gmra.mrb[2].mxu0 %vm825_vm11, %v807_v53  ;;  %v470_v45 = vpop.permute.xlu0 %469 }
 0x140   :  { %v726_v26 = vsel %vm720_vm7, %v709_v18, %v470_v45 }
 0x141   :  { %624 = vrot.lane.b32.xlu1 %v248_v41, %s2905_s29  ;;  %292 = vrot.lane.b32.xlu0 %v3450_v44, %s2898_s13  ;;  %v3546_v41 = vmax.f32 %v3119_v47, %v3301_v57  ;;  %v252_v47 = vsel %vm223_vm0, %v249_v54, %v251_v28 }
 0x143   :  { %v517_v17 = vpop.permute.xlu1 %516  ;;  %v3535_v50 = vpop.permute.xlu0 %327  ;;  %v253_v57 = vrot.slane %v3546_v41, 1  ;;  %v257_v9 = vrot.slane %v3546_v41, 7 }
 0x144   :  { %v742_v54 = vsel %vm737_vm8, %v725_v4, %v517_v17 }
 0x145   :  { %436 = vrot.lane.b32.xlu1 %v3450_v44, %s2899_s0  ;;  %483 = vrot.lane.b32.xlu0 %v250_v31, %s2903_s20  ;;  %v254_v58 = vsel %vm223_vm0, %v251_v28, %v253_v57  ;;  %v258_v5 = vsel %vm176_vm1, %v204_v2, %v257_v9  ;;  %v260_v45 = vsel %vm223_vm0, %v253_v57, 0.0  ;;  %v659_v28 = vsel %vm652_vm3, %v3255_v32, %v3371_v22  ;;  %v794_v22 = vld [vmem:[%s4804_s7 + $0x30] sm:$0xff] }
 0x146   :  { %v676_v46 = vsel %vm669_vm4, %v659_v28, %v3529_v24 }
 0x147   :  { %v3542_v37 = vpop.permute.xlu1 %374  ;;  %v519_v10 = vpop.permute.xlu0 %518 }
 0x148   :  { %v743_v43 = vsel %vm737_vm8, %v726_v26, %v519_v10  ;;  %v262_v10 = vsel %vm176_vm1, %v257_v9, 0.0 }
 0x149   :  { %626 = vrot.lane.b32.xlu1 %v250_v31, %s2905_s29  ;;  %294 = vrot.lane.b32.xlu0 %v159_v56, %s2898_s13 }
 0x14b   :  { %v565_v55 = vpop.permute.xlu1 %564  ;;  %v3553_v35 = vpop.permute.xlu0 %376 }
 0x14c   :  { %v759_v23 = vsel %vm754_vm9, %v742_v54, %v565_v55  ;;  %v693_v55 = vsel %vm686_vm5, %v676_v46, %v3542_v37 }
 0x14d   :  { %341 = vrot.lane.b32.xlu1 %v252_v47, %s2901_s14  ;;  %485 = vrot.lane.b32.xlu0 %v252_v47, %s2903_s20 }
 0x14f   :  { %v3564_v31 = vpop.permute.xlu1 %422  ;;  %v567_v21 = vpop.permute.xlu0 %566 }
 0x150   :  { %v760_v36 = vsel %vm754_vm9, %v743_v43, %v567_v21  ;;  %v710_v57 = vsel %vm703_vm6, %v693_v55, %v3564_v31  ;;  %v660_v21 = vsel %vm652_vm3, %v3273_v49, %v3378_v27 }
 0x151   :  { %532 = vrot.lane.b32.xlu1 %v3512_v38, %s2904_s26  ;;  %343 = vrot.lane.b32.xlu0 %v254_v58, %s2901_s14 }
 0x153   :  { %v613_v7 = vpop.permute.xlu1 %612  ;;  %v3581_v25 = vpop.permute.xlu0 %280 }
 0x154   :  { %v776_v8 = vsel %vm771_vm10, %v759_v23, %v613_v7  ;;  %v661_v43 = vsel %vm652_vm3, %v3280_v51, %v3581_v25 }
 0x155   :  { %v808_v30 = vmul.f32 %v792_v0, %v776_v8  ;;  %390 = vrot.lane.b32.xlu1 %v3589_v61, %s2902_s15  ;;  %534 = vrot.lane.b32.xlu0 %v3589_v61, %s2904_s26 }
 0x157   :  { %v425_v15 = vpop.permute.xlu1 %424  ;;  %2529 = vmatprep.mubr.msk.f32.mxu0 %vm825_vm11, %v808_v30  ;;  %v472_v59 = vpop.permute.xlu0 %471 }
 0x158   :  { %v727_v1 = vsel %vm720_vm7, %v710_v57, %v472_v59 }
 0x159   :  { %580 = vrot.lane.b32.xlu1 %v3450_v44, %s2900_s25  ;;  %392 = vrot.lane.b32.xlu0 %v258_v5, %s2902_s15  ;;  %s2911_s15 = smov 48  }
 0x15b   :  { %v615_v34 = vpop.permute.xlu1 %614  ;;  %v3610_v12 = vpop.permute.xlu0 %282 }
 0x15c   :  { %v777_v20 = vsel %vm771_vm10, %v760_v36, %v615_v34 }
 0x15d   :  { %v809_v14 = vmul.f32 %v793_v33, %v777_v20  ;;  %438 = vrot.lane.b32.xlu1 %v159_v56, %s2899_s0  ;;  %582 = vrot.lane.b32.xlu0 %v159_v56, %s2900_s25 }
 0x15f   :  { %v3615_v44 = vpop.permute.xlu1 %329  ;;  %2530 = vmatmul.mubr.msk.f32.gmra.mrb[4].mxu0 %vm825_vm11, %v809_v14  ;;  %v474_v29 = vpop.permute.xlu0 %473 }
 0x160   :  { %v678_v33 = vsel %vm669_vm4, %v661_v43, %v3615_v44 }
 0x161   :  { %628 = vrot.lane.b32.xlu1 %v252_v47, %s2905_s29  ;;  %440 = vrot.lane.b32.xlu0 %v3546_v41, %s2899_s0 }
 0x163   :  { %v521_v3 = vpop.permute.xlu1 %520  ;;  %v3621_v39 = vpop.permute.xlu0 %331 }
 0x164   :  { %v744_v32 = vsel %vm737_vm8, %v727_v1, %v521_v3 }
 0x165   :  { %487 = vrot.lane.b32.xlu1 %v254_v58, %s2903_s20  ;;  %630 = vrot.lane.b32.xlu0 %v254_v58, %s2905_s29  ;;  %v677_v58 = vsel %vm669_vm4, %v660_v21, %v3535_v50 }
 0x166   :  { %v694_v2 = vsel %vm686_vm5, %v677_v58, %v3553_v35 }
 0x167   :  { %v379_v40 = vpop.permute.xlu1 %378  ;;  %v523_v53 = vpop.permute.xlu0 %522  ;;  %v711_v0 = vsel %vm703_vm6, %v694_v2, %v425_v15 }
 0x168   :  { %v728_v49 = vsel %vm720_vm7, %v711_v0, %v474_v29  ;;  %v695_v36 = vsel %vm686_vm5, %v678_v33, %v379_v40  ;;  %v662_v40 = vsel %vm652_vm3, %v3331_v6, %v3610_v12  ;;  %v797_v6 = vld [vmem:[%s4804_s7 + $0x48] sm:$0xff] }
 0x169   :  { %489 = vrot.lane.b32.xlu1 %v260_v45, %s2903_s20  ;;  %536 = vrot.lane.b32.xlu0 %v258_v5, %s2904_s26  ;;  %v745_v27 = vsel %vm737_vm8, %v728_v49, %v523_v53  ;;  %v796_v53 = vld [vmem:[%s4804_s7 + $0x40] sm:$0xff] }
 0x16b   :  { %v569_v17 = vpop.permute.xlu1 %568  ;;  %v3628_v56 = vpop.permute.xlu0 %380 }
 0x16c   :  { %v761_v24 = vsel %vm754_vm9, %v744_v32, %v569_v17 }
 0x16d   :  { %538 = vrot.lane.b32.xlu1 %v262_v10, %s2904_s26  ;;  %584 = vrot.lane.b32.xlu0 %v3546_v41, %s2900_s25  ;;  %v679_v10 = vsel %vm669_vm4, %v662_v40, %v3621_v39 }
 0x16e   :  { %v696_v28 = vsel %vm686_vm5, %v679_v10, %v3628_v56 }
 0x16f   :  { %v427_v63 = vpop.permute.xlu1 %426  ;;  %v571_v47 = vpop.permute.xlu0 %570 }
 0x170   :  { %v762_v23 = vsel %vm754_vm9, %v745_v27, %v571_v47  ;;  %v712_v14 = vsel %vm703_vm6, %v695_v36, %v427_v63 }
 0x171   :  { %586 = vrot.lane.b32.xlu1 %v4811_v48, %s2900_s25  ;;  %632 = vrot.lane.b32.xlu0 %v260_v45, %s2905_s29  ;;  %s2912_s25 = smov 64  }
 0x173   :  { %v617_v37 = vpop.permute.xlu1 %616  ;;  %v3652_v41 = vpop.permute.xlu0 %284 }
 0x174   :  { %v778_v31 = vsel %vm771_vm10, %v761_v24, %v617_v37 }
 0x175   :  { %v810_v13 = vmul.f32 %v794_v22, %v778_v31  ;;  %634 = vrot.lane.b32.xlu1 %v4811_v48, %s2905_s29  ;;  %1351 = vrot.lane.b32.xlu0 %v4811_v48, %s2901_s14 }
 0x177   :  { %v429_v4 = vpop.permute.xlu1 %428  ;;  %2532 = vmatprep.mubr.msk.f32.mxu0 %vm825_vm11, %v810_v13  ;;  %v476_v54 = vpop.permute.xlu0 %475 }
 0x178   :  { %v729_v29 = vsel %vm720_vm7, %v712_v14, %v476_v54  ;;  %v713_v63 = vsel %vm703_vm6, %v696_v28, %v429_v4  ;;  %v663_v4 = vsel %vm652_vm3, %v3343_v11, %v3652_v41 }
 0x17b   :  { %v619_v50 = vpop.permute.xlu1 %618  ;;  %v3674_v7 = vpop.permute.xlu0 %286 }
 0x17c   :  { %v779_v35 = vsel %vm771_vm10, %v762_v23, %v619_v50 }
 0x17d   :  { %v811_v62 = vmul.f32 %v795_v16, %v779_v35  ;;  %v798_v35 = vld [vmem:[%s4804_s7 + $0x50] sm:$0xff] }
 0x17f   :  { %v334_v8 = vpop.permute.xlu1 %333  ;;  %2533 = vmatmul.mubr.msk.f32.gmra.mrb[6].mxu0 %vm825_vm11, %v811_v62  ;;  %v478_v9 = vpop.permute.xlu0 %477 }
 0x180   :  { %v730_v47 = vsel %vm720_vm7, %v713_v63, %v478_v9  ;;  %v680_v54 = vsel %vm669_vm4, %v663_v4, %v334_v8  ;;  %v664_v8 = vsel %vm652_vm3, %v3391_v42, %v3674_v7 }
 0x183   :  { %v525_v30 = vpop.permute.xlu1 %524  ;;  %v336_v15 = vpop.permute.xlu0 %335 }
 0x184   :  { %v746_v3 = vsel %vm737_vm8, %v729_v29, %v525_v30 }
 0x187   :  { %v383_v59 = vpop.permute.xlu1 %382  ;;  %v527_v18 = vpop.permute.xlu0 %526 }
 0x188   :  { %v747_v57 = vsel %vm737_vm8, %v730_v47, %v527_v18  ;;  %v697_v0 = vsel %vm686_vm5, %v680_v54, %v383_v59  ;;  %v681_v59 = vsel %vm669_vm4, %v664_v8, %v336_v15 }
 0x18b   :  { %v573_v5 = vpop.permute.xlu1 %572  ;;  %v385_v26 = vpop.permute.xlu0 %384 }
 0x18c   :  { %v763_v45 = vsel %vm754_vm9, %v746_v3, %v573_v5  ;;  %v698_v18 = vsel %vm686_vm5, %v681_v59, %v385_v26 }
 0x18f   :  { %v431_v34 = vpop.permute.xlu1 %430  ;;  %v575_v20 = vpop.permute.xlu0 %574 }
 0x190   :  { %v764_v12 = vsel %vm754_vm9, %v747_v57, %v575_v20  ;;  %v714_v16 = vsel %vm703_vm6, %v697_v0, %v431_v34  ;;  %v799_v20 = vld [vmem:[%s4804_s7 + $0x58] sm:$0xff] }
 0x193   :  { %v621_v51 = vpop.permute.xlu1 %620  ;;  %v3693_v25 = vpop.permute.xlu0 %288 }
 0x194   :  { %v780_v44 = vsel %vm771_vm10, %v763_v45, %v621_v51  ;;  %v665_v10 = vsel %vm652_vm3, %v3404_v52, %v3693_v25  ;;  %v800_v52 = vld [vmem:[%s4804_s7 + $0x60] sm:$0xff] }
 0x195   :  { %v812_v17 = vmul.f32 %v796_v53, %v780_v44 }
 0x197   :  { %v433_v46 = vpop.permute.xlu1 %432  ;;  %2535 = vmatprep.mubr.msk.f32.mxu0 %vm825_vm11, %v812_v17  ;;  %v480_v55 = vpop.permute.xlu0 %479 }
 0x198   :  { %v731_v23 = vsel %vm720_vm7, %v714_v16, %v480_v55  ;;  %v715_v33 = vsel %vm703_vm6, %v698_v18, %v433_v46 }
 0x19b   :  { %v623_v39 = vpop.permute.xlu1 %622  ;;  %v291_v1 = vpop.permute.xlu0 %290 }
 0x19c   :  { %v781_v56 = vsel %vm771_vm10, %v764_v12, %v623_v39  ;;  %v666_v57 = vsel %vm652_vm3, %v3492_v19, %v291_v1 }
 0x19d   :  { %v813_v32 = vmul.f32 %v797_v6, %v781_v56 }
 0x19f   :  { %v338_v22 = vpop.permute.xlu1 %337  ;;  %2536 = vmatmul.mubr.msk.f32.gmra.mrb[8].mxu0 %vm825_vm11, %v813_v32  ;;  %v482_v24 = vpop.permute.xlu0 %481 }
 0x1a0   :  { %v732_v36 = vsel %vm720_vm7, %v715_v33, %v482_v24  ;;  %v682_v28 = vsel %vm669_vm4, %v665_v10, %v338_v22 }
 0x1a3   :  { %v529_v37 = vpop.permute.xlu1 %528  ;;  %v340_v31 = vpop.permute.xlu0 %339 }
 0x1a4   :  { %v748_v50 = vsel %vm737_vm8, %v731_v23, %v529_v37  ;;  %v683_v12 = vsel %vm669_vm4, %v666_v57, %v340_v31 }
 0x1a7   :  { %v387_v21 = vpop.permute.xlu1 %386  ;;  %v531_v13 = vpop.permute.xlu0 %530 }
 0x1a8   :  { %v749_v34 = vsel %vm737_vm8, %v732_v36, %v531_v13  ;;  %v699_v46 = vsel %vm686_vm5, %v682_v28, %v387_v21  ;;  %v801_v21 = vld [vmem:[%s4804_s7 + $0x68] sm:$0xff] }
 0x1ab   :  { %v577_v58 = vpop.permute.xlu1 %576  ;;  %v389_v2 = vpop.permute.xlu0 %388 }
 0x1ac   :  { %v765_v62 = vsel %vm754_vm9, %v748_v50, %v577_v58  ;;  %v700_v25 = vsel %vm686_vm5, %v683_v12, %v389_v2 }
 0x1af   :  { %v435_v49 = vpop.permute.xlu1 %434  ;;  %v579_v27 = vpop.permute.xlu0 %578 }
 0x1b0   :  { %v766_v42 = vsel %vm754_vm9, %v749_v34, %v579_v27  ;;  %v716_v47 = vsel %vm703_vm6, %v699_v46, %v435_v49 }
 0x1b3   :  { %v625_v9 = vpop.permute.xlu1 %624  ;;  %v293_v11 = vpop.permute.xlu0 %292 }
 0x1b4   :  { %v782_v41 = vsel %vm771_vm10, %v765_v62, %v625_v9  ;;  %v667_v27 = vsel %vm652_vm3, %v3512_v38, %v293_v11  ;;  %v802_v38 = vld [vmem:[%s4804_s7 + $0x70] sm:$0xff] }
 0x1b5   :  { %v814_v30 = vmul.f32 %v798_v35, %v782_v41 }
 0x1b7   :  { %v437_v5 = vpop.permute.xlu1 %436  ;;  %2538 = vmatprep.mubr.msk.f32.mxu0 %vm825_vm11, %v814_v30  ;;  %v484_v43 = vpop.permute.xlu0 %483 }
 0x1b8   :  { %v733_v6 = vsel %vm720_vm7, %v716_v47, %v484_v43  ;;  %v717_v24 = vsel %vm703_vm6, %v700_v25, %v437_v5 }
 0x1bb   :  { %v627_v7 = vpop.permute.xlu1 %626  ;;  %v295_v15 = vpop.permute.xlu0 %294 }
 0x1bc   :  { %v783_v26 = vsel %vm771_vm10, %v766_v42, %v627_v7  ;;  %v668_v9 = vsel %vm652_vm3, %v3589_v61, %v295_v15  ;;  %vm1912_vm3 = vcmask 588800  }
 0x1bd   :  { %v815_v14 = vmul.f32 %v799_v20, %v783_v26  ;;  %v803_v20 = vld [vmem:[%s4804_s7 + $0x78] sm:$0xff]  ;;  %s2909_s7 = smov 56  }
 0x1be   :  { %1673 = vrot.lane.b32.xlu1 %v4811_v48, %s2909_s7 }
 0x1bf   :  { %v342_v29 = vpop.permute.xlu1 %341  ;;  %2539 = vmatmul.mubr.msk.f32.gmra.mrb[10].mxu0 %vm825_vm11, %v815_v14  ;;  %v486_v3 = vpop.permute.xlu0 %485 }
 0x1c0   :  { %v734_v1 = vsel %vm720_vm7, %v717_v24, %v486_v3  ;;  %v684_v16 = vsel %vm669_vm4, %v667_v27, %v342_v29 }
 0x1c3   :  { %v533_v53 = vpop.permute.xlu1 %532  ;;  %v344_v45 = vpop.permute.xlu0 %343 }
 0x1c4   :  { %v750_v39 = vsel %vm737_vm8, %v733_v6, %v533_v53  ;;  %v685_v8 = vsel %vm669_vm4, %v668_v9, %v344_v45 }
 0x1c7   :  { %v391_v51 = vpop.permute.xlu1 %390  ;;  %v535_v44 = vpop.permute.xlu0 %534 }
 0x1c8   :  { %v751_v31 = vsel %vm737_vm8, %v734_v1, %v535_v44  ;;  %v701_v23 = vsel %vm686_vm5, %v684_v16, %v391_v51 }
 0x1cb   :  { %v581_v40 = vpop.permute.xlu1 %580  ;;  %v393_v17 = vpop.permute.xlu0 %392 }
 0x1cc   :  { %v767_v56 = vsel %vm754_vm9, %v750_v39, %v581_v40  ;;  %v702_v11 = vsel %vm686_vm5, %v685_v8, %v393_v17 }
 0x1cf   :  { %v439_v55 = vpop.permute.xlu1 %438  ;;  %v583_v63 = vpop.permute.xlu0 %582 }
 0x1d0   :  { %v768_v13 = vsel %vm754_vm9, %v751_v31, %v583_v63  ;;  %v718_v62 = vsel %vm703_vm6, %v701_v23, %v439_v55 }
 0x1d3   :  { %v629_v32 = vpop.permute.xlu1 %628  ;;  %v441_v22 = vpop.permute.xlu0 %440 }
 0x1d4   :  { %v784_v19 = vsel %vm771_vm10, %v767_v56, %v629_v32  ;;  %v719_v43 = vsel %vm703_vm6, %v702_v11, %v441_v22  ;;  %v4807_v11 = vmov 1.0  }
 0x1d5   :  { %v816_v37 = vmul.f32 %v800_v52, %v784_v19 }
 0x1d7   :  { %v488_v58 = vpop.permute.xlu1 %487  ;;  %2541 = vmatprep.mubr.msk.f32.mxu0 %vm825_vm11, %v816_v37  ;;  %v631_v2 = vpop.permute.xlu0 %630 }
 0x1d8   :  { %v785_v4 = vsel %vm771_vm10, %v768_v13, %v631_v2  ;;  %v735_v41 = vsel %vm720_vm7, %v718_v62, %v488_v58 }
 0x1d9   :  { %v817_v54 = vmul.f32 %v801_v21, %v785_v4 }
 0x1db   :  { %v490_v0 = vpop.permute.xlu1 %489  ;;  %2542 = vmatmul.mubr.msk.f32.gmra.mrb[12].mxu0 %vm825_vm11, %v817_v54  ;;  %v537_v49 = vpop.permute.xlu0 %536 }
 0x1dc   :  { %v752_v30 = vsel %vm737_vm8, %v735_v41, %v537_v49  ;;  %v736_v33 = vsel %vm720_vm7, %v719_v43, %v490_v0 }
 0x1df   :  { %v539_v50 = vpop.permute.xlu1 %538  ;;  %v585_v35 = vpop.permute.xlu0 %584 }
 0x1e0   :  { %v769_v59 = vsel %vm754_vm9, %v752_v30, %v585_v35  ;;  %v753_v34 = vsel %vm737_vm8, %v736_v33, %v539_v50 }
 0x1e3   :  { %v587_v18 = vpop.permute.xlu1 %586  ;;  %v633_v5 = vpop.permute.xlu0 %632 }
 0x1e4   :  { %v786_v61 = vsel %vm771_vm10, %v769_v59, %v633_v5  ;;  %v770_v42 = vsel %vm754_vm9, %v753_v34, %v587_v18 }
 0x1e5   :  { %v818_v36 = vmul.f32 %v802_v38, %v786_v61 }
 0x1e7   :  { %v635_v7 = vpop.permute.xlu1 %634  ;;  %2544 = vmatprep.mubr.msk.f32.mxu0 %vm825_vm11, %v818_v36 }
 0x1e8   :  { %v787_v15 = vsel %vm771_vm10, %v770_v42, %v635_v7  ;;  %v1192_v7 = vlaneseq }
 0x1e9   :  { %v819_v26 = vmul.f32 %v803_v20, %v787_v15 }
 0x1ea   :  { %v1193_v15 = vshrl.u32 %v1192_v7, 7 }
 0x1eb   :  { %2545 = vmatmul.mubr.msk.f32.gmra.mrb[14].mxu0 %vm825_vm11, %v819_v26  ;;  %v1184_v26 = vld [vmem:[%s4799_s2] sm:$0x1] }
 0x1ec   :  { %2614 = vmatprep.mubr.msk.f32.mxu0 %vm2907_vm12, %v4811_v48 }
 0x1fe   :  { %v3794_v14 = vpop.f32.mrb[0].mxu0 }
 0x1ff   :  { %v1094_v29 = vmul.f32 %v3794_v14, %v3794_v14  ;;  %v3798_v3 = vpop.f32.mrb[1].mxu0 }
 0x200   :  { %v1093_v53 = vmul.f32 %v3798_v3, %v3798_v3  ;;  %v2738_v45 = vpack.c.bf16 %v3794_v14, %v3798_v3 }
 0x202   :  { %v2762_v51 = vpack.c.bf16 %v1094_v29, %v1093_v53  ;;  %2739 = vmatpush3.bf16.msra.mxu1 %v2738_v45  ;;  %v3892_v29 = vsub.s32 0, %v1193_v15 }
 0x203   :  { %2740 = vmatprep.subr.bf16.mxu1 %v4809_v60 }
 0x204   :  { %2763 = vmatpush3.bf16.msra.mxu0 %v2762_v51  ;;  %4818 = vst [vmem:[#allocation5_spill] sm:$0xff] %v3892_v29  ;;  %v1188_v51 = vld [vmem:[%s4800_s3] sm:$0x1] }
 0x205   :  { %2764 = vmatprep.subr.bf16.mxu0 %v4809_v60 }
 0x212   :  { %v3806_v44 = vpop.f32.mrb[2].mxu0 }
 0x213   :  { %v1096_v40 = vmul.f32 %v3806_v44, %v3806_v44  ;;  %v3810_v17 = vpop.f32.mrb[3].mxu0 }
 0x214   :  { %v2741_v10 = vpack.c.bf16 %v3806_v44, %v3810_v17  ;;  %v1095_v28 = vmul.f32 %v3810_v17, %v3810_v17 }
 0x216   :  { %v2765_v46 = vpack.c.bf16 %v1096_v40, %v1095_v28  ;;  %2742 = vmatpush3.bf16.msra.mxu1 %v2741_v10 }
 0x217   :  { %2743 = vmatprep.subr.bf16.mxu1 %v4809_v60 }
 0x218   :  { %2766 = vmatpush3.bf16.msra.mxu0 %v2765_v46 }
 0x219   :  { %2767 = vmatprep.subr.bf16.mxu0 %v4809_v60 }
 0x232   :  { %v3818_v55 = vpop.f32.mrb[4].mxu0 }
 0x233   :  { %v1098_v63 = vmul.f32 %v3818_v55, %v3818_v55  ;;  %v3822_v47 = vpop.f32.mrb[5].mxu0 }
 0x234   :  { %v2744_v57 = vpack.c.bf16 %v3818_v55, %v3822_v47  ;;  %v1097_v6 = vmul.f32 %v3822_v47, %v3822_v47 }
 0x236   :  { %v2768_v12 = vpack.c.bf16 %v1098_v63, %v1097_v6  ;;  %2745 = vmatpush3.bf16.msra.mxu1 %v2744_v57 }
 0x237   :  { %2746 = vmatprep.subr.bf16.mxu1 %v4809_v60 }
 0x238   :  { %2769 = vmatpush3.bf16.msra.mxu0 %v2768_v12 }
 0x239   :  { %2770 = vmatprep.subr.bf16.mxu0 %v4809_v60 }
 0x252   :  { %v3834_v39 = vpop.f32.mrb[6].mxu0 }
 0x253   :  { %v1100_v52 = vmul.f32 %v3834_v39, %v3834_v39  ;;  %v3838_v25 = vpop.f32.mrb[7].mxu0 }
 0x254   :  { %v2747_v56 = vpack.c.bf16 %v3834_v39, %v3838_v25  ;;  %v1099_v32 = vmul.f32 %v3838_v25, %v3838_v25 }
 0x256   :  { %v2771_v22 = vpack.c.bf16 %v1100_v52, %v1099_v32  ;;  %2748 = vmatpush3.bf16.msra.mxu1 %v2747_v56 }
 0x257   :  { %2749 = vmatprep.subr.bf16.mxu1 %v4809_v60 }
 0x258   :  { %2772 = vmatpush3.bf16.msra.mxu0 %v2771_v22 }
 0x259   :  { %2773 = vmatprep.subr.bf16.mxu0 %v4809_v60 }
 0x272   :  { %v3846_v24 = vpop.f32.mrb[8].mxu0 }
 0x273   :  { %v1102_v19 = vmul.f32 %v3846_v24, %v3846_v24  ;;  %v3850_v1 = vpop.f32.mrb[9].mxu0 }
 0x274   :  { %v2750_v37 = vpack.c.bf16 %v3846_v24, %v3850_v1  ;;  %v1101_v31 = vmul.f32 %v3850_v1, %v3850_v1 }
 0x276   :  { %v2774_v21 = vpack.c.bf16 %v1102_v19, %v1101_v31  ;;  %2751 = vmatpush3.bf16.msra.mxu1 %v2750_v37 }
 0x277   :  { %2752 = vmatprep.subr.bf16.mxu1 %v4809_v60 }
 0x278   :  { %2775 = vmatpush3.bf16.msra.mxu0 %v2774_v21 }
 0x279   :  { %2776 = vmatprep.subr.bf16.mxu0 %v4809_v60 }
 0x292   :  { %v3858_v13 = vpop.f32.mrb[10].mxu0 }
 0x293   :  { %v1104_v58 = vmul.f32 %v3858_v13, %v3858_v13  ;;  %v3862_v2 = vpop.f32.mrb[11].mxu0 }
 0x294   :  { %v2753_v4 = vpack.c.bf16 %v3858_v13, %v3862_v2  ;;  %v1103_v54 = vmul.f32 %v3862_v2, %v3862_v2 }
 0x296   :  { %v2777_v0 = vpack.c.bf16 %v1104_v58, %v1103_v54  ;;  %2754 = vmatpush3.bf16.msra.mxu1 %v2753_v4 }
 0x297   :  { %2755 = vmatprep.subr.bf16.mxu1 %v4809_v60 }
 0x298   :  { %2778 = vmatpush3.bf16.msra.mxu0 %v2777_v0 }
 0x299   :  { %2779 = vmatprep.subr.bf16.mxu0 %v4809_v60 }
 0x2ae   :  { %v2543_v49 = vpop.f32.mrb[12].mxu0 }
 0x2af   :  { %v1106_v27 = vmul.f32 %v2543_v49, %v2543_v49  ;;  %v1004_v16 = vpop.f32.mrb[13].mxu0 }
 0x2b0   :  { %v2756_v23 = vpack.c.bf16 %v2543_v49, %v1004_v16  ;;  %v1105_v50 = vmul.f32 %v1004_v16, %v1004_v16 }
 0x2b2   :  { %v2780_v35 = vpack.c.bf16 %v1106_v27, %v1105_v50  ;;  %2757 = vmatpush3.bf16.msra.mxu1 %v2756_v23 }
 0x2b3   :  { %2758 = vmatprep.subr.bf16.mxu1 %v4809_v60 }
 0x2b4   :  { %2781 = vmatpush3.bf16.msra.mxu0 %v2780_v35 }
 0x2b5   :  { %2782 = vmatprep.subr.bf16.mxu0 %v4809_v60 }
 0x2be   :  { %v3872_v62 = vpop.f32.mrb[14].mxu0 }
 0x2bf   :  { %v1108_v9 = vmul.f32 %v3872_v62, %v3872_v62  ;;  %v3876_v41 = vpop.f32.mrb[15].mxu0 }
 0x2c0   :  { %v2759_v8 = vpack.c.bf16 %v3872_v62, %v3876_v41  ;;  %v1107_v30 = vmul.f32 %v3876_v41, %v3876_v41 }
 0x2c2   :  { %v2783_v38 = vpack.c.bf16 %v1108_v9, %v1107_v30  ;;  %2760 = vmatpush3.bf16.msra.mxu1 %v2759_v8 }
 0x2c4   :  { %2784 = vmatpush3.bf16.msra.mxu0 %v2783_v38 }
 0x2c5   :  { %2580 = vmatmul.mubr.f32.vlgmr.msra.gmra.mrb[0].mxu1 %v4807_v11  ;;  %2801 = vmatprep.subr.bf16.mxu0 %v4809_v60 }
 0x2c7   :  { %2615 = vmatmul.mubr.f32.vlgmr.msra.gmra.mrb[16].mxu0 %v4807_v11 }
 0x2c8   :  { %2691 = vmatprep.mubr.msk.f32.mxu0 %vm2907_vm12, %v4811_v48 }
 0x398   :  { %v1089_v59 = vpop.f32.mrb[0].mxu1 }
 0x399   :  { %v1179_v18 = vmul.f32 0.0078125, %v1089_v59  ;;  %v2581_v5 = vpop.f32.mrb[1].mxu1 }
 0x39a   :  { %v1175_v43 = vpop.f32.mrb[16].mxu0 }
 0x39b   :  { %v1181_v61 = vmul.f32 %v1179_v18, %v1179_v18  ;;  %v1180_v33 = vmul.f32 0.0078125, %v1175_v43  ;;  %v2616_v36 = vpop.f32.mrb[17].mxu0 }
 0x39d   :  { %v1182_v34 = vsub.f32 %v1180_v33, %v1181_v61 }
 0x39f   :  { %v1183_v20 = vmax.f32 %v1182_v34, 0.0 }
 0x3a1   :  { %v1185_v42 = vadd.f32 1e-05, %v1183_v20 }
 0x3a3   :  { %2868 = vrsqrt.f32 %v1185_v42 }
 0x3ad   :  { %v2869_v53 = vpop.eup %2868 }
 0x3ae   :  { %v1187_v45 = vmul.f32 %v2869_v53, %v1184_v26 }
 0x3b0   :  { %v1189_v40 = vmul.f32 %v1187_v45, %v1179_v18  ;;  %v1195_v10 = vrot.slane %v1187_v45, %v3892_v29 }
 0x3b2   :  { %v1190_v28 = vsub.f32 %v1188_v51, %v1189_v40  ;;  %v1197_v46 = vmul.f32 %v1195_v10, %v3798_v3  ;;  %v1198_v63 = vmul.f32 %v3794_v14, %v1195_v10  ;;  %v1199_v57 = vmul.f32 %v1195_v10, %v3810_v17 }
 0x3b3   :  { %v1200_v6 = vmul.f32 %v3806_v44, %v1195_v10  ;;  %v1201_v12 = vmul.f32 %v1195_v10, %v3822_v47  ;;  %v1202_v52 = vmul.f32 %v3818_v55, %v1195_v10  ;;  %v1203_v56 = vmul.f32 %v1195_v10, %v3838_v25 }
 0x3b4   :  { %v1217_v32 = vrot.slane %v1190_v28, %v3892_v29  ;;  %v1204_v22 = vmul.f32 %v3834_v39, %v1195_v10  ;;  %v1205_v19 = vmul.f32 %v1195_v10, %v3850_v1  ;;  %v1206_v3 = vmul.f32 %v3846_v24, %v1195_v10 }
 0x3b5   :  { %v1207_v14 = vmul.f32 %v1195_v10, %v3862_v2  ;;  %v1208_v17 = vmul.f32 %v3858_v13, %v1195_v10  ;;  %v1209_v37 = vmul.f32 %v1195_v10, %v1004_v16  ;;  %v1210_v44 = vmul.f32 %v2543_v49, %v1195_v10 }
 0x3b6   :  { %v1219_v31 = vadd.f32 %v1217_v32, %v1197_v46  ;;  %v1220_v47 = vadd.f32 %v1217_v32, %v1198_v63  ;;  %v1221_v21 = vadd.f32 %v1217_v32, %v1199_v57  ;;  %v1222_v55 = vadd.f32 %v1217_v32, %v1200_v6 }
 0x3b7   :  { %v1223_v58 = vadd.f32 %v1217_v32, %v1201_v12  ;;  %v1224_v25 = vadd.f32 %v1217_v32, %v1202_v52  ;;  %v1225_v4 = vadd.f32 %v1217_v32, %v1203_v56  ;;  %v1226_v54 = vadd.f32 %v1217_v32, %v1204_v22 }
 0x3b8   :  { %v3911_v0 = vmax.f32 %v1219_v31, 0.0  ;;  %v1236_v39 = vmax.f32 %v1220_v47, 0.0  ;;  %v1237_v1 = vmax.f32 %v1221_v21, 0.0  ;;  %v3913_v27 = vmax.f32 %v1222_v55, 0.0 }
 0x3b9   :  { %v3919_v24 = vmax.f32 %v1223_v58, 0.0  ;;  %v1227_v13 = vadd.f32 %v1217_v32, %v1205_v19  ;;  %v1228_v2 = vadd.f32 %v1217_v32, %v1206_v3  ;;  %v1229_v49 = vadd.f32 %v1217_v32, %v1207_v14 }
 0x3ba   :  { %1497 = vrot.lane.b32.xlu0 %v3911_v0, %s2905_s29  ;;  %1353 = vrot.lane.b32.xlu1 %v3911_v0, %s2901_s14  ;;  %v1230_v16 = vadd.f32 %v1217_v32, %v1208_v17  ;;  %v1231_v23 = vadd.f32 %v1217_v32, %v1209_v37  ;;  %v1232_v50 = vadd.f32 %v1217_v32, %v1210_v44  ;;  %v3922_v9 = vmax.f32 %v1224_v25, 0.0 }
 0x3bb   :  { %v1211_v35 = vmul.f32 %v1195_v10, %v3876_v41  ;;  %v3924_v8 = vmax.f32 %v1225_v4, 0.0  ;;  %v1212_v30 = vmul.f32 %v3872_v62, %v1195_v10  ;;  %v1312_v38 = vrot.slane %v3911_v0, 1 }
 0x3bc   :  { %v3928_v59 = vmax.f32 %v1226_v54, 0.0  ;;  %v3930_v18 = vmax.f32 %v1227_v13, 0.0  ;;  %v3932_v5 = vmax.f32 %v1228_v2, 0.0  ;;  %v1313_v61 = vrot.slane %v1236_v39, 1 }
 0x3bd   :  { %v3934_v43 = vadd.f32 %v1217_v32, %v1211_v35  ;;  %v3938_v41 = vadd.f32 %v1217_v32, %v1212_v30  ;;  %v1266_v33 = vrot.slane %v3911_v0, 7  ;;  %v1267_v62 = vrot.slane %v1236_v39, 7  ;;  %v1911_v0 = vld [vmem:[%s4801_s4 + $0x40] sm:$0xff] }
 0x3be   :  { %1499 = vrot.lane.b32.xlu0 %v1236_v39, %s2905_s29  ;;  %1355 = vrot.lane.b32.xlu1 %v1236_v39, %s2901_s14  ;;  %v3941_v36 = vmax.f32 %v1229_v49, 0.0  ;;  %v3943_v34 = vmax.f32 %v1230_v16, 0.0  ;;  %v1315_v20 = vrot.slane %v1237_v1, 1  ;;  %v1317_v42 = vrot.slane %v3913_v27, 1 }
 0x3bf   :  { %v3946_v7 = vmax.f32 %v1231_v23, 0.0  ;;  %v3948_v15 = vmax.f32 %v1232_v50, 0.0  ;;  %v3953_v26 = vsel %vm223_vm0, %v1312_v38, %v1313_v61  ;;  %v3958_v53 = vsel %vm176_vm1, %v1266_v33, %v1267_v62 }
 0x3c0   :  { %v3961_v45 = vsel %vm223_vm0, %v1313_v61, %v1315_v20  ;;  %v3964_v51 = vsel %vm223_vm0, %v1315_v20, %v1317_v42  ;;  %v1269_v40 = vrot.slane %v1237_v1, 7  ;;  %v1271_v10 = vrot.slane %v3913_v27, 7 }
 0x3c1   :  { %v1319_v28 = vrot.slane %v3919_v24, 1  ;;  %v1321_v46 = vrot.slane %v3922_v9, 1  ;;  %v1273_v63 = vrot.slane %v3919_v24, 7  ;;  %v1275_v57 = vrot.slane %v3922_v9, 7 }
 0x3c2   :  { %1357 = vrot.lane.b32.xlu0 %v1237_v1, %s2901_s14  ;;  %1643 = vrot.lane.b32.xlu1 %v1236_v39, %s2909_s7  ;;  %v3974_v6 = vsel %vm176_vm1, %v1267_v62, %v1269_v40  ;;  %v3977_v12 = vsel %vm176_vm1, %v1269_v40, %v1271_v10  ;;  %v1323_v52 = vrot.slane %v3924_v8, 1  ;;  %v1277_v56 = vrot.slane %v3924_v8, 7 }
 0x3c3   :  { %v3982_v32 = vsel %vm223_vm0, %v1317_v42, %v1319_v28  ;;  %v3985_v22 = vsel %vm223_vm0, %v1319_v28, %v1321_v46  ;;  %v3988_v19 = vsel %vm176_vm1, %v1271_v10, %v1273_v63  ;;  %v3991_v3 = vsel %vm176_vm1, %v1273_v63, %v1275_v57  ;;  %v1909_v63 = vld [vmem:[%s4801_s4 + $0x30] sm:$0xff] }
 0x3c4   :  { %v3994_v14 = vsel %vm223_vm0, %v1321_v46, %v1323_v52  ;;  %v3997_v17 = vsel %vm176_vm1, %v1275_v57, %v1277_v56  ;;  %v1325_v37 = vrot.slane %v3928_v59, 1  ;;  %v1279_v44 = vrot.slane %v3928_v59, 7 }
 0x3c5   :  { %v1281_v31 = vrot.slane %v3930_v18, 7  ;;  %v1327_v47 = vrot.slane %v3930_v18, 1  ;;  %v1283_v21 = vrot.slane %v3932_v5, 7  ;;  %v1329_v55 = vrot.slane %v3932_v5, 1 }
 0x3c6   :  { %1645 = vrot.lane.b32.xlu0 %v1237_v1, %s2909_s7  ;;  %1501 = vrot.lane.b32.xlu1 %v1237_v1, %s2905_s29  ;;  %v4008_v58 = vsel %vm223_vm0, %v1323_v52, %v1325_v37  ;;  %v4011_v25 = vsel %vm176_vm1, %v1277_v56, %v1279_v44  ;;  %v1285_v4 = vrot.slane %v3941_v36, 7  ;;  %v1287_v54 = vrot.slane %v3943_v34, 7  ;;  %v4199_v52 = vpop.permute.xlu0 %1351 }
 0x3c7   :  { %v4016_v39 = vsel %vm176_vm1, %v1279_v44, %v1281_v31  ;;  %v4019_v1 = vsel %vm223_vm0, %v1325_v37, %v1327_v47  ;;  %v4022_v13 = vsel %vm176_vm1, %v1281_v31, %v1283_v21  ;;  %v4025_v2 = vsel %vm223_vm0, %v1327_v47, %v1329_v55 }
 0x3c8   :  { %v4028_v49 = vsel %vm176_vm1, %v1283_v21, %v1285_v4  ;;  %v4031_v16 = vsel %vm176_vm1, %v1285_v4, %v1287_v54  ;;  %v1331_v23 = vrot.slane %v3941_v36, 1  ;;  %v1289_v50 = vrot.slane %v3946_v7, 7 }
 0x3c9   :  { %v1333_v35 = vrot.slane %v3943_v34, 1  ;;  %v4814_v30 = vrot.slane %v3948_v15, 7  ;;  %v1335_v61 = vrot.slane %v3946_v7, 1  ;;  %v4813_v42 = vrot.slane %v3948_v15, 1 }
 0x3ca   :  { %1359 = vrot.lane.b32.xlu0 %v3913_v27, %s2901_s14  ;;  %1503 = vrot.lane.b32.xlu1 %v3913_v27, %s2905_s29  ;;  %v4043_v62 = vsel %vm223_vm0, %v1329_v55, %v1331_v23  ;;  %v4046_v20 = vsel %vm176_vm1, %v1287_v54, %v1289_v50 }
 0x3cb   :  { %v4050_v40 = vsel %vm223_vm0, %v1331_v23, %v1333_v35  ;;  %v4055_v10 = vsel %vm176_vm1, %v1289_v50, %v4814_v30  ;;  %v4058_v28 = vsel %vm223_vm0, %v1333_v35, %v1335_v61  ;;  %v4063_v46 = vsel %vm223_vm0, %v1335_v61, %v4813_v42 }
 0x3ce   :  { %1361 = vrot.lane.b32.xlu0 %v3919_v24, %s2901_s14  ;;  %1647 = vrot.lane.b32.xlu1 %v3913_v27, %s2909_s7  ;;  %v4126_v27 = vmax.f32 %v3934_v43, 0.0 }
 0x3d0   :  { %v4817_v29 = vrot.slane %v4126_v27, 7 }
 0x3d2   :  { %1649 = vrot.lane.b32.xlu0 %v3919_v24, %s2909_s7  ;;  %1505 = vrot.lane.b32.xlu1 %v3919_v24, %s2905_s29  ;;  %v4137_v24 = vmax.f32 %v3938_v41, 0.0  ;;  %v1344_v41 = vsel %vm223_vm0, 0.0, %v1312_v38  ;;  %v4174_v38 = vsel %vm176_vm1, 0.0, %v1266_v33  ;;  %v4197_v33 = vpop.permute.xlu1 %1673 }
 0x3d3   :  { %4819 = vst [vmem:[#allocation6_spill] sm:$0xff] %v4197_v33 }
 0x3d6   :  { %1363 = vrot.lane.b32.xlu0 %v3922_v9, %s2901_s14  ;;  %1507 = vrot.lane.b32.xlu1 %v3922_v9, %s2905_s29 }
 0x3da   :  { %1365 = vrot.lane.b32.xlu0 %v3924_v8, %s2901_s14  ;;  %1651 = vrot.lane.b32.xlu1 %v3922_v9, %s2909_s7  ;;  %v1903_v9 = vld [vmem:[%s4801_s4] sm:$0xff] }
 0x3de   :  { %1653 = vrot.lane.b32.xlu0 %v3924_v8, %s2909_s7  ;;  %1509 = vrot.lane.b32.xlu1 %v3924_v8, %s2905_s29  ;;  %v1904_v8 = vld [vmem:[%s4801_s4 + $0x8] sm:$0xff] }
 0x3e2   :  { %1367 = vrot.lane.b32.xlu0 %v3928_v59, %s2901_s14  ;;  %1511 = vrot.lane.b32.xlu1 %v3928_v59, %s2905_s29 }
 0x3e6   :  { %1369 = vrot.lane.b32.xlu0 %v3930_v18, %s2901_s14  ;;  %1655 = vrot.lane.b32.xlu1 %v3928_v59, %s2909_s7  ;;  %v2785_v59 = vpack.c.bf16 %v1904_v8, %v1903_v9 }
 0x3e8   :  { %2786 = vmatprep.subr.bf16.mxu1 %v2785_v59 }
 0x3e9   :  { %2788 = vmatpush3.bf16.msra.mxu1 %v2785_v59 }
 0x3ea   :  { %1657 = vrot.lane.b32.xlu0 %v3930_v18, %s2909_s7  ;;  %1513 = vrot.lane.b32.xlu1 %v3930_v18, %s2905_s29  ;;  %v1905_v18 = vld [vmem:[%s4801_s4 + $0x10] sm:$0xff] }
 0x3ee   :  { %1371 = vrot.lane.b32.xlu0 %v3932_v5, %s2901_s14  ;;  %1515 = vrot.lane.b32.xlu1 %v3932_v5, %s2905_s29 }
 0x3f2   :  { %1373 = vrot.lane.b32.xlu0 %v3941_v36, %s2901_s14  ;;  %1659 = vrot.lane.b32.xlu1 %v3932_v5, %s2909_s7  ;;  %v1906_v5 = vld [vmem:[%s4801_s4 + $0x18] sm:$0xff] }
 0x3f3   :  { %v2789_v43 = vpack.c.bf16 %v1906_v5, %v1905_v18 }
 0x3f5   :  { %2790 = vmatprep.subr.bf16.mxu1 %v2789_v43 }
 0x3f6   :  { %1661 = vrot.lane.b32.xlu0 %v3941_v36, %s2909_s7  ;;  %1517 = vrot.lane.b32.xlu1 %v3941_v36, %s2905_s29  ;;  %v1907_v36 = vld [vmem:[%s4801_s4 + $0x20] sm:$0xff] }
 0x3f7   :  { %2792 = vmatpush3.bf16.msra.mxu1 %v2789_v43 }
 0x3fa   :  { %1375 = vrot.lane.b32.xlu0 %v3943_v34, %s2901_s14  ;;  %1519 = vrot.lane.b32.xlu1 %v3943_v34, %s2905_s29 }
 0x3fe   :  { %1377 = vrot.lane.b32.xlu0 %v3946_v7, %s2901_s14  ;;  %1663 = vrot.lane.b32.xlu1 %v3943_v34, %s2909_s7  ;;  %v1908_v34 = vld [vmem:[%s4801_s4 + $0x28] sm:$0xff] }
 0x402   :  { %1665 = vrot.lane.b32.xlu0 %v3946_v7, %s2909_s7  ;;  %1521 = vrot.lane.b32.xlu1 %v3946_v7, %s2905_s29  ;;  %v2793_v7 = vpack.c.bf16 %v1908_v34, %v1907_v36 }
 0x404   :  { %2794 = vmatprep.subr.bf16.mxu1 %v2793_v7 }
 0x405   :  { %2796 = vmatpush3.bf16.msra.mxu1 %v2793_v7 }
 0x406   :  { %1379 = vrot.lane.b32.xlu0 %v3948_v15, %s2901_s14  ;;  %1523 = vrot.lane.b32.xlu1 %v3948_v15, %s2905_s29 }
 0x40a   :  { %1381 = vrot.lane.b32.xlu0 %v4126_v27, %s2901_s14  ;;  %1667 = vrot.lane.b32.xlu1 %v3948_v15, %s2909_s7 }
 0x40e   :  { %1669 = vrot.lane.b32.xlu0 %v4126_v27, %s2909_s7  ;;  %1525 = vrot.lane.b32.xlu1 %v4126_v27, %s2905_s29 }
 0x412   :  { %1527 = vrot.lane.b32.xlu0 %v4137_v24, %s2905_s29  ;;  %1402 = vrot.lane.b32.xlu1 %v3953_v26, %s2899_s0 }
 0x416   :  { %1671 = vrot.lane.b32.xlu0 %v4137_v24, %s2909_s7  ;;  %1451 = vrot.lane.b32.xlu1 %v3958_v53, %s2904_s26 }
 0x41a   :  { %1400 = vrot.lane.b32.xlu0 %v1344_v41, %s2899_s0  ;;  %1546 = vrot.lane.b32.xlu1 %v3953_v26, %s2910_s18  ;;  %v1910_v26 = vld [vmem:[%s4801_s4 + $0x38] sm:$0xff] }
 0x41b   :  { %v2797_v57 = vpack.c.bf16 %v1910_v26, %v1909_v63 }
 0x41d   :  { %2798 = vmatprep.subr.bf16.mxu1 %v2797_v57 }
 0x41e   :  { %1449 = vrot.lane.b32.xlu0 %v4174_v38, %s2904_s26  ;;  %1404 = vrot.lane.b32.xlu1 %v3961_v45, %s2899_s0 }
 0x41f   :  { %2800 = vmatpush3.bf16.msra.mxu1 %v2797_v57 }
 0x420   :  { %2633 = vmatprep.subr.mxu1 %v1911_v0 }
 0x422   :  { %1548 = vrot.lane.b32.xlu0 %v3961_v45, %s2910_s18  ;;  %1595 = vrot.lane.b32.xlu1 %v3958_v53, %s2911_s15 }
 0x423   :  { %2634 = vmatpush3.msra.mxu1 %v1911_v0 }
 0x424   :  { %2825 = vmatprep.subr.bf16.mxu1 %v4809_v60 }
 0x426   :  { %1406 = vrot.lane.b32.xlu0 %v3964_v51, %s2899_s0  ;;  %1453 = vrot.lane.b32.xlu1 %v3974_v6, %s2904_s26 }
 0x42a   :  { %1597 = vrot.lane.b32.xlu0 %v3974_v6, %s2911_s15  ;;  %1691 = vrot.lane.b32.xlu1 %v3961_v45, %s2912_s25 }
 0x42c   :  { %v4206_v56 = vpop.permute.xlu1 %1353  ;;  %v4208_v37 = vpop.permute.xlu0 %1497 }
 0x42e   :  { %1455 = vrot.lane.b32.xlu0 %v3977_v12, %s2904_s26  ;;  %1693 = vrot.lane.b32.xlu1 %v3964_v51, %s2912_s25 }
 0x430   :  { %v4214_v44 = vpop.permute.xlu1 %1355  ;;  %v4216_v31 = vpop.permute.xlu0 %1499 }
 0x432   :  { %1550 = vrot.lane.b32.xlu0 %v3964_v51, %s2910_s18  ;;  %1408 = vrot.lane.b32.xlu1 %v3982_v32, %s2899_s0 }
 0x434   :  { %v4222_v45 = vpop.permute.xlu1 %1643  ;;  %v4224_v47 = vpop.permute.xlu0 %1357 }
 0x436   :  { %1552 = vrot.lane.b32.xlu0 %v3982_v32, %s2910_s18  ;;  %1599 = vrot.lane.b32.xlu1 %v3977_v12, %s2911_s15 }
 0x438   :  { %v4230_v21 = vpop.permute.xlu1 %1501  ;;  %v4232_v55 = vpop.permute.xlu0 %1645 }
 0x43a   :  { %1410 = vrot.lane.b32.xlu0 %v3985_v22, %s2899_s0  ;;  %1457 = vrot.lane.b32.xlu1 %v3988_v19, %s2904_s26 }
 0x43c   :  { %v4238_v51 = vpop.permute.xlu1 %1503  ;;  %v4240_v4 = vpop.permute.xlu0 %1359 }
 0x43e   :  { %1601 = vrot.lane.b32.xlu0 %v3988_v19, %s2911_s15  ;;  %1695 = vrot.lane.b32.xlu1 %v3982_v32, %s2912_s25 }
 0x440   :  { %v4246_v54 = vpop.permute.xlu1 %1647  ;;  %v4248_v23 = vpop.permute.xlu0 %1361 }
 0x442   :  { %1459 = vrot.lane.b32.xlu0 %v3991_v3, %s2904_s26  ;;  %1697 = vrot.lane.b32.xlu1 %v3985_v22, %s2912_s25 }
 0x444   :  { %v4254_v50 = vpop.permute.xlu1 %1505  ;;  %v4256_v35 = vpop.permute.xlu0 %1649 }
 0x446   :  { %1554 = vrot.lane.b32.xlu0 %v3985_v22, %s2910_s18  ;;  %1412 = vrot.lane.b32.xlu1 %v3994_v14, %s2899_s0 }
 0x448   :  { %v4262_v32 = vpop.permute.xlu1 %1507  ;;  %v4264_v61 = vpop.permute.xlu0 %1363 }
 0x44a   :  { %1556 = vrot.lane.b32.xlu0 %v3994_v14, %s2910_s18  ;;  %1603 = vrot.lane.b32.xlu1 %v3991_v3, %s2911_s15 }
 0x44c   :  { %v4270_v9 = vpop.permute.xlu1 %1651  ;;  %v4272_v8 = vpop.permute.xlu0 %1365 }
 0x44e   :  { %1414 = vrot.lane.b32.xlu0 %v4008_v58, %s2899_s0  ;;  %1461 = vrot.lane.b32.xlu1 %v3997_v17, %s2904_s26 }
 0x450   :  { %v4278_v22 = vpop.permute.xlu1 %1509  ;;  %v4280_v59 = vpop.permute.xlu0 %1653 }
 0x452   :  { %1605 = vrot.lane.b32.xlu0 %v3997_v17, %s2911_s15  ;;  %1699 = vrot.lane.b32.xlu1 %v3994_v14, %s2912_s25 }
 0x454   :  { %v4286_v18 = vpop.permute.xlu1 %1511  ;;  %v4288_v5 = vpop.permute.xlu0 %1367 }
 0x456   :  { %1463 = vrot.lane.b32.xlu0 %v4011_v25, %s2904_s26  ;;  %1701 = vrot.lane.b32.xlu1 %v4008_v58, %s2912_s25 }
 0x458   :  { %v4294_v43 = vpop.permute.xlu1 %1655  ;;  %v4296_v41 = vpop.permute.xlu0 %1369 }
 0x45a   :  { %1558 = vrot.lane.b32.xlu0 %v4008_v58, %s2910_s18  ;;  %1416 = vrot.lane.b32.xlu1 %v4019_v1, %s2899_s0 }
 0x45c   :  { %v4302_v14 = vpop.permute.xlu1 %1513  ;;  %v4304_v36 = vpop.permute.xlu0 %1657 }
 0x45e   :  { %1560 = vrot.lane.b32.xlu0 %v4019_v1, %s2910_s18  ;;  %1607 = vrot.lane.b32.xlu1 %v4011_v25, %s2911_s15 }
 0x460   :  { %v4310_v34 = vpop.permute.xlu1 %1515  ;;  %v4312_v7 = vpop.permute.xlu0 %1371 }
 0x462   :  { %1418 = vrot.lane.b32.xlu0 %v4025_v2, %s2899_s0  ;;  %1465 = vrot.lane.b32.xlu1 %v4016_v39, %s2904_s26 }
 0x464   :  { %v4318_v58 = vpop.permute.xlu1 %1659  ;;  %v1374_v63 = vpop.permute.xlu0 %1373 }
 0x465   :  { %v4322_v26 = vsel %vm669_vm4, %v4028_v49, %v1374_v63 }
 0x466   :  { %1609 = vrot.lane.b32.xlu0 %v4016_v39, %s2911_s15  ;;  %1703 = vrot.lane.b32.xlu1 %v4019_v1, %s2912_s25 }
 0x468   :  { %v4328_v57 = vpop.permute.xlu1 %1517  ;;  %v4330_v0 = vpop.permute.xlu0 %1661 }
 0x46a   :  { %1467 = vrot.lane.b32.xlu0 %v4022_v13, %s2904_s26  ;;  %1705 = vrot.lane.b32.xlu1 %v4025_v2, %s2912_s25 }
 0x46c   :  { %v4336_v11 = vpop.permute.xlu1 %1519  ;;  %v1376_v63 = vpop.permute.xlu0 %1375 }
 0x46d   :  { %v4340_v60 = vsel %vm669_vm4, %v4031_v16, %v1376_v63 }
 0x46e   :  { %4820 = vst [vmem:[#allocation7_spill] sm:$0xff] %v4340_v60  ;;  %1562 = vrot.lane.b32.xlu0 %v4025_v2, %s2910_s18  ;;  %1420 = vrot.lane.b32.xlu1 %v4043_v62, %s2899_s0 }
 0x470   :  { %v4346_v1 = vpop.permute.xlu1 %1663  ;;  %v1378_v48 = vpop.permute.xlu0 %1377 }
 0x471   :  { %4821 = vst [vmem:[#allocation8_spill] sm:$0xff] %v4346_v1  ;;  %v4350_v42 = vsel %vm669_vm4, %v4046_v20, %v1378_v48  ;;  %v1341_v1 = vrot.slane %v4137_v24, 1 }
 0x472   :  { %4822 = vst [vmem:[#allocation9_spill] sm:$0xff] %v4350_v42  ;;  %1564 = vrot.lane.b32.xlu0 %v4043_v62, %s2910_s18  ;;  %1611 = vrot.lane.b32.xlu1 %v4022_v13, %s2911_s15 }
 0x474   :  { %v4356_v63 = vpop.permute.xlu1 %1521  ;;  %v4358_v30 = vpop.permute.xlu0 %1665 }
 0x475   :  { %4823 = vst [vmem:[#allocation10_spill] sm:$0xff] %v4356_v63  ;;  %4824 = vst [vmem:[#allocation11_spill] sm:$0xff] %v4358_v30  ;;  %v4828_v63 = vrot.slane %v3948_v15, 7 }
 0x476   :  { %1422 = vrot.lane.b32.xlu0 %v4050_v40, %s2899_s0  ;;  %1469 = vrot.lane.b32.xlu1 %v4028_v49, %s2904_s26 }
 0x478   :  { %v4364_v2 = vpop.permute.xlu1 %1523  ;;  %v1380_v48 = vpop.permute.xlu0 %1379 }
 0x479   :  { %4825 = vst [vmem:[#allocation12_spill] sm:$0xff] %v4364_v2  ;;  %v4369_v33 = vsel %vm669_vm4, %v4055_v10, %v1380_v48  ;;  %v4382_v2 = vsel %vm176_vm1, %v4828_v63, %v4817_v29 }
 0x47a   :  { %4826 = vst [vmem:[#allocation13_spill] sm:$0xff] %v4369_v33  ;;  %1707 = vrot.lane.b32.xlu1 %v4043_v62, %s2912_s25  ;;  %1613 = vrot.lane.b32.xlu0 %v4028_v49, %s2911_s15 }
 0x47c   :  { %v4375_v42 = vpop.permute.xlu1 %1667  ;;  %v1382_v60 = vpop.permute.xlu0 %1381 }
 0x47d   :  { %4827 = vst [vmem:[#allocation14_spill] sm:$0xff] %v4375_v42  ;;  %v4386_v48 = vsel %vm669_vm4, %v4382_v2, %v1382_v60  ;;  %v1339_v42 = vrot.slane %v4126_v27, 1 }
 0x47e   :  { %4829 = vst [vmem:[#allocation15_spill] sm:$0xff] %v4386_v48  ;;  %1709 = vrot.lane.b32.xlu1 %v4050_v40, %s2912_s25  ;;  %1471 = vrot.lane.b32.xlu0 %v4031_v16, %s2904_s26 }
 0x480   :  { %v4392_v49 = vpop.permute.xlu1 %1525  ;;  %v4394_v62 = vpop.permute.xlu0 %1669 }
 0x481   :  { %4830 = vst [vmem:[#allocation16_spill] sm:$0xff] %v4392_v49  ;;  %4831 = vst [vmem:[#allocation17_spill] sm:$0xff] %v4394_v62 }
 0x482   :  { %1424 = vrot.lane.b32.xlu1 %v4058_v28, %s2899_s0  ;;  %1566 = vrot.lane.b32.xlu0 %v4050_v40, %s2910_s18 }
 0x484   :  { %v1403_v63 = vpop.permute.xlu1 %1402  ;;  %v4400_v29 = vpop.permute.xlu0 %1527 }
 0x485   :  { %4832 = vst [vmem:[#allocation18_spill] sm:$0xff] %v4400_v29 }
 0x486   :  { %1615 = vrot.lane.b32.xlu1 %v4031_v16, %s2911_s15  ;;  %1568 = vrot.lane.b32.xlu0 %v4058_v28, %s2910_s18  ;;  %v1739_v16 = vsel %vm669_vm4, 0.0, %v4199_v52 }
 0x488   :  { %v1452_v60 = vpop.permute.xlu1 %1451  ;;  %v4406_v48 = vpop.permute.xlu0 %1671 }
 0x489   :  { %4833 = vst [vmem:[#allocation19_spill] sm:$0xff] %v4406_v48 }
 0x48a   :  { %1473 = vrot.lane.b32.xlu1 %v4046_v20, %s2904_s26  ;;  %1426 = vrot.lane.b32.xlu0 %v4063_v46, %s2899_s0 }
 0x48c   :  { %v1547_v49 = vpop.permute.xlu1 %1546  ;;  %v1401_v40 = vpop.permute.xlu0 %1400 }
 0x48d   :  { %v1755_v29 = vsel %vm703_vm6, %v1739_v16, %v1401_v40  ;;  %v4834_v40 = vrot.slane %v3948_v15, 1 }
 0x48e   :  { %1711 = vrot.lane.b32.xlu1 %v4058_v28, %s2912_s25  ;;  %1617 = vrot.lane.b32.xlu0 %v4046_v20, %s2911_s15 }
 0x48f   :  { %v1340_v16 = vsel %vm223_vm0, %v4834_v40, %v1339_v42 }
 0x490   :  { %v1405_v48 = vpop.permute.xlu1 %1404  ;;  %v1450_v62 = vpop.permute.xlu0 %1449 }
 0x491   :  { %v1771_v33 = vsel %vm737_vm8, %v1755_v29, %v1450_v62  ;;  %v1740_v29 = vsel %vm669_vm4, %v4174_v38, %v4206_v56  ;;  %v1871_v38 = vld [vmem:[%s4805_s8] sm:$0xff] }
 0x492   :  { %1713 = vrot.lane.b32.xlu1 %v4063_v46, %s2912_s25  ;;  %1475 = vrot.lane.b32.xlu0 %v4055_v10, %s2904_s26  ;;  %v1787_v20 = vsel %vm771_vm10, %v1771_v33, %v4208_v37  ;;  %v1756_v33 = vsel %vm703_vm6, %v1740_v29, %v1403_v63 }
 0x493   :  { %v1804_v62 = vsel %vm1803_vm13, %v1787_v20, %v1547_v49  ;;  %v1772_v37 = vsel %vm737_vm8, %v1756_v33, %v1452_v60  ;;  %v1345_v33 = vrot.slane %v4137_v24, 7 }
 0x494   :  { %v1596_v28 = vpop.permute.xlu1 %1595  ;;  %v1549_v52 = vpop.permute.xlu0 %1548 }
 0x495   :  { %v1821_v40 = vsel %vm1820_vm14, %v1804_v62, %v1596_v28  ;;  %v1342_v28 = vsel %vm223_vm0, %v1339_v42, %v1341_v1 }
 0x496   :  { %1428 = vrot.lane.b32.xlu1 %v1340_v16, %s2899_s0  ;;  %1570 = vrot.lane.b32.xlu0 %v4063_v46, %s2910_s18  ;;  %v1788_v46 = vsel %vm771_vm10, %v1772_v37, %v4216_v31  ;;  %v1838_v63 = vsel %vm1837_vm15, %v1821_v40, %v4222_v45  ;;  %v1872_v31 = vld [vmem:[%s4805_s8 + $0x8] sm:$0xff] }
 0x497   :  { %v1805_v56 = vsel %vm1803_vm13, %v1788_v46, %v1549_v52 }
 0x498   :  { %v1454_v30 = vpop.permute.xlu1 %1453  ;;  %v1407_v15 = vpop.permute.xlu0 %1406 }
 0x49a   :  { %1619 = vrot.lane.b32.xlu1 %v4055_v10, %s2911_s15  ;;  %1572 = vrot.lane.b32.xlu0 %v1340_v16, %s2910_s18 }
 0x49c   :  { %v1692_v49 = vpop.permute.xlu1 %1691  ;;  %v1598_v60 = vpop.permute.xlu0 %1597 }
 0x49d   :  { %v1855_v20 = vsel %vm1854_vm2, %v1838_v63, %v1692_v49  ;;  %v1822_v10 = vsel %vm1820_vm14, %v1805_v56, %v1598_v60  ;;  %v1741_v56 = vsel %vm669_vm4, %v3958_v53, %v4214_v44  ;;  %v1348_v63 = vsel %vm223_vm0, %v1341_v1, 0.0 }
 0x49e   :  { %v1887_v29 = vmul.f32 %v1871_v38, %v1855_v20  ;;  %1477 = vrot.lane.b32.xlu1 %v4382_v2, %s2904_s26  ;;  %1430 = vrot.lane.b32.xlu0 %v1342_v28, %s2899_s0  ;;  %v1839_v45 = vsel %vm1837_vm15, %v1822_v10, %v4232_v55  ;;  %v4835_v38 = vrot.slane %v4126_v27, 7  ;;  %v1757_v24 = vsel %vm703_vm6, %v1741_v56, %v1405_v48 }
 0x49f   :  { %v1742_v27 = vsel %vm669_vm4, %v3974_v6, %v4224_v47  ;;  %v1350_v10 = vsel %vm176_vm1, %v1345_v33, 0.0  ;;  %v1873_v47 = vld [vmem:[%s4805_s8 + $0x10] sm:$0xff]  ;;  %v1743_v56 = vsel %vm669_vm4, %v3977_v12, %v4240_v4 }
 0x4a0   :  { %v1694_v52 = vpop.permute.xlu1 %1693  ;;  %2635 = vmatprep.mubr.msk.f32.mxu1 %vm1912_vm3, %v1887_v29  ;;  %v1456_v62 = vpop.permute.xlu0 %1455  ;;  %v1346_v55 = vsel %vm176_vm1, %v4835_v38, %v1345_v33  ;;  %v1758_v53 = vsel %vm703_vm6, %v1742_v27, %v1407_v15 }
 0x4a1   :  { %v1856_v42 = vsel %vm1854_vm2, %v1839_v45, %v1694_v52  ;;  %v1774_v48 = vsel %vm737_vm8, %v1758_v53, %v1456_v62  ;;  %v4836_v62 = vmov 0.0  }
 0x4a2   :  { %v1888_v37 = vmul.f32 %v1872_v31, %v1856_v42  ;;  %1715 = vrot.lane.b32.xlu1 %v1340_v16, %s2912_s25  ;;  %1621 = vrot.lane.b32.xlu0 %v4382_v2, %s2911_s15  ;;  %v1773_v2 = vsel %vm737_vm8, %v1757_v24, %v1454_v30  ;;  %v1790_v6 = vsel %vm771_vm10, %v1774_v48, %v4238_v51  ;;  %v1874_v51 = vld [vmem:[%s4805_s8 + $0x18] sm:$0xff] }
 0x4a3   :  { %v1789_v44 = vsel %vm771_vm10, %v1773_v2, %v4230_v21 }
 0x4a4   :  { %v1409_v40 = vpop.permute.xlu1 %1408  ;;  %2636 = vmatmul.mubr.msk.f32.vlgmr.msra.gmra.mrb[2].mxu1 %vm1912_vm3, %v1888_v37  ;;  %v1551_v46 = vpop.permute.xlu0 %1550 }
 0x4a5   :  { %v1806_v30 = vsel %vm1803_vm13, %v1789_v44, %v1551_v46  ;;  %v1759_v24 = vsel %vm703_vm6, %v1743_v56, %v1409_v40 }
 0x4a6   :  { %1574 = vrot.lane.b32.xlu1 %v1342_v28, %s2910_s18  ;;  %1479 = vrot.lane.b32.xlu0 %v1346_v55, %s2904_s26 }
 0x4a8   :  { %v1600_v16 = vpop.permute.xlu1 %1599  ;;  %v1553_v49 = vpop.permute.xlu0 %1552 }
 0x4a9   :  { %v1823_v1 = vsel %vm1820_vm14, %v1806_v30, %v1600_v16  ;;  %v1807_v21 = vsel %vm1803_vm13, %v1790_v6, %v1553_v49  ;;  %v1744_v49 = vsel %vm669_vm4, %v3988_v19, %v4248_v23  ;;  %v1875_v19 = vld [vmem:[%s4805_s8 + $0x20] sm:$0xff] }
 0x4aa   :  { %1576 = vrot.lane.b32.xlu1 %v1348_v63, %s2910_s18  ;;  %1717 = vrot.lane.b32.xlu0 %v1342_v28, %s2912_s25  ;;  %v1840_v28 = vsel %vm1837_vm15, %v1823_v1, %v4246_v54 }
 0x4ac   :  { %v1458_v60 = vpop.permute.xlu1 %1457  ;;  %v1411_v20 = vpop.permute.xlu0 %1410 }
 0x4ad   :  { %v1775_v2 = vsel %vm737_vm8, %v1759_v24, %v1458_v60 }
 0x4ae   :  { %1625 = vrot.lane.b32.xlu1 %v1350_v10, %s2911_s15  ;;  %1623 = vrot.lane.b32.xlu0 %v1346_v55, %s2911_s15  ;;  %v1791_v27 = vsel %vm771_vm10, %v1775_v2, %v4254_v50 }
 0x4b0   :  { %v1696_v15 = vpop.permute.xlu1 %1695  ;;  %v1602_v29 = vpop.permute.xlu0 %1601 }
 0x4b1   :  { %v1857_v31 = vsel %vm1854_vm2, %v1840_v28, %v1696_v15  ;;  %v1824_v52 = vsel %vm1820_vm14, %v1807_v21, %v1602_v29 }
 0x4b2   :  { %v1889_v45 = vmul.f32 %v1873_v47, %v1857_v31  ;;  %1721 = vrot.lane.b32.xlu1 %v4836_v62, %s2912_s25  ;;  %1719 = vrot.lane.b32.xlu0 %v1348_v63, %s2912_s25  ;;  %v1841_v33 = vsel %vm1837_vm15, %v1824_v52, %v4256_v35  ;;  %v1760_v63 = vsel %vm703_vm6, %v1744_v49, %v1411_v20 }
 0x4b3   :  { %v1745_v31 = vsel %vm669_vm4, %v3991_v3, %v4264_v61 }
 0x4b4   :  { %v1698_v42 = vpop.permute.xlu1 %1697  ;;  %2638 = vmatprep.mubr.msk.f32.mxu1 %vm1912_vm3, %v1889_v45  ;;  %v1460_v54 = vpop.permute.xlu0 %1459 }
 0x4b5   :  { %v1858_v37 = vsel %vm1854_vm2, %v1841_v33, %v1698_v42  ;;  %v1776_v53 = vsel %vm737_vm8, %v1760_v63, %v1460_v54  ;;  %v1746_v42 = vsel %vm669_vm4, %v3997_v17, %v4272_v8  ;;  %v1877_v17 = vld [vmem:[%s4805_s8 + $0x30] sm:$0xff] }
 0x4b6   :  { %v1890_v46 = vmul.f32 %v1874_v51, %v1858_v37  ;;  %v1792_v48 = vsel %vm771_vm10, %v1776_v53, %v4262_v32  ;;  %v1876_v32 = vld [vmem:[%s4805_s8 + $0x28] sm:$0xff] }
 0x4b8   :  { %v1413_v38 = vpop.permute.xlu1 %1412  ;;  %2639 = vmatmul.mubr.msk.f32.gmra.mrb[4].mxu1 %vm1912_vm3, %v1890_v46  ;;  %v1555_v55 = vpop.permute.xlu0 %1554 }
 0x4b9   :  { %v1808_v44 = vsel %vm1803_vm13, %v1791_v27, %v1555_v55  ;;  %v1761_v52 = vsel %vm703_vm6, %v1745_v31, %v1413_v38 }
 0x4bc   :  { %v1604_v16 = vpop.permute.xlu1 %1603  ;;  %v1557_v35 = vpop.permute.xlu0 %1556 }
 0x4bd   :  { %v1825_v40 = vsel %vm1820_vm14, %v1808_v44, %v1604_v16  ;;  %v1809_v23 = vsel %vm1803_vm13, %v1792_v48, %v1557_v35 }
 0x4be   :  { %v1842_v50 = vsel %vm1837_vm15, %v1825_v40, %v4270_v9 }
 0x4c0   :  { %v1462_v12 = vpop.permute.xlu1 %1461  ;;  %v1415_v4 = vpop.permute.xlu0 %1414 }
 0x4c1   :  { %v1777_v45 = vsel %vm737_vm8, %v1761_v52, %v1462_v12  ;;  %v1762_v33 = vsel %vm703_vm6, %v1746_v42, %v1415_v4  ;;  %v1747_v4 = vsel %vm669_vm4, %v4011_v25, %v4288_v5 }
 0x4c2   :  { %v1793_v54 = vsel %vm771_vm10, %v1777_v45, %v4278_v22 }
 0x4c4   :  { %v1700_v30 = vpop.permute.xlu1 %1699  ;;  %v1606_v60 = vpop.permute.xlu0 %1605 }
 0x4c5   :  { %v1859_v20 = vsel %vm1854_vm2, %v1842_v50, %v1700_v30  ;;  %v1826_v1 = vsel %vm1820_vm14, %v1809_v23, %v1606_v60  ;;  %v1748_v23 = vsel %vm669_vm4, %v4016_v39, %v4296_v41  ;;  %v1879_v39 = vld [vmem:[%s4805_s8 + $0x40] sm:$0xff] }
 0x4c6   :  { %v1891_v10 = vmul.f32 %v1875_v19, %v1859_v20  ;;  %v1843_v47 = vsel %vm1837_vm15, %v1826_v1, %v4280_v59 }
 0x4c8   :  { %v1702_v6 = vpop.permute.xlu1 %1701  ;;  %2641 = vmatprep.mubr.msk.f32.mxu1 %vm1912_vm3, %v1891_v10  ;;  %v1464_v21 = vpop.permute.xlu0 %1463 }
 0x4c9   :  { %v1860_v15 = vsel %vm1854_vm2, %v1843_v47, %v1702_v6  ;;  %v1778_v37 = vsel %vm737_vm8, %v1762_v33, %v1464_v21 }
 0x4ca   :  { %v1892_v9 = vmul.f32 %v1876_v32, %v1860_v15  ;;  %v1794_v55 = vsel %vm771_vm10, %v1778_v37, %v4286_v18  ;;  %v1878_v18 = vld [vmem:[%s4805_s8 + $0x38] sm:$0xff] }
 0x4cc   :  { %v1417_v28 = vpop.permute.xlu1 %1416  ;;  %2642 = vmatmul.mubr.msk.f32.gmra.mrb[6].mxu1 %vm1912_vm3, %v1892_v9  ;;  %v1559_v29 = vpop.permute.xlu0 %1558 }
 0x4cd   :  { %v1810_v46 = vsel %vm1803_vm13, %v1793_v54, %v1559_v29  ;;  %v1763_v40 = vsel %vm703_vm6, %v1747_v4, %v1417_v28 }
 0x4d0   :  { %v1608_v51 = vpop.permute.xlu1 %1607  ;;  %v1561_v59 = vpop.permute.xlu0 %1560 }
 0x4d1   :  { %v1827_v38 = vsel %vm1820_vm14, %v1810_v46, %v1608_v51  ;;  %v1811_v8 = vsel %vm1803_vm13, %v1794_v55, %v1561_v59  ;;  %v1749_v51 = vsel %vm669_vm4, %v4022_v13, %v4312_v7  ;;  %v1881_v55 = vld [vmem:[%s4805_s8 + $0x50] sm:$0xff] }
 0x4d2   :  { %v1844_v22 = vsel %vm1837_vm15, %v1827_v38, %v4294_v43 }
 0x4d4   :  { %v1466_v3 = vpop.permute.xlu1 %1465  ;;  %v1419_v61 = vpop.permute.xlu0 %1418 }
 0x4d5   :  { %v1779_v48 = vsel %vm737_vm8, %v1763_v40, %v1466_v3  ;;  %v1764_v30 = vsel %vm703_vm6, %v1748_v23, %v1419_v61 }
 0x4d6   :  { %v1795_v50 = vsel %vm771_vm10, %v1779_v48, %v4302_v14 }
 0x4d8   :  { %v1704_v56 = vpop.permute.xlu1 %1703  ;;  %v1610_v24 = vpop.permute.xlu0 %1609 }
 0x4d9   :  { %v1861_v2 = vsel %vm1854_vm2, %v1844_v22, %v1704_v56  ;;  %v1828_v16 = vsel %vm1820_vm14, %v1811_v8, %v1610_v24  ;;  %v4837_v8 = vld [vmem:[#allocation8_spill] sm:$0xff] }
 0x4da   :  { %v1893_v35 = vmul.f32 %v1877_v17, %v1861_v2  ;;  %v1845_v63 = vsel %vm1837_vm15, %v1828_v16, %v4304_v36 }
 0x4dc   :  { %v1706_v49 = vpop.permute.xlu1 %1705  ;;  %2644 = vmatprep.mubr.msk.f32.mxu1 %vm1912_vm3, %v1893_v35  ;;  %v1468_v27 = vpop.permute.xlu0 %1467  ;;  %v4838_v35 = vld [vmem:[#allocation11_spill] sm:$0xff] }
 0x4dd   :  { %v1862_v53 = vsel %vm1854_vm2, %v1845_v63, %v1706_v49  ;;  %v1780_v60 = vsel %vm737_vm8, %v1764_v30, %v1468_v27 }
 0x4de   :  { %v1894_v43 = vmul.f32 %v1878_v18, %v1862_v53  ;;  %v1796_v10 = vsel %vm771_vm10, %v1780_v60, %v4310_v34  ;;  %v1880_v34 = vld [vmem:[%s4805_s8 + $0x48] sm:$0xff] }
 0x4e0   :  { %v1421_v44 = vpop.permute.xlu1 %1420  ;;  %2645 = vmatmul.mubr.msk.f32.gmra.mrb[8].mxu1 %vm1912_vm3, %v1894_v43  ;;  %v1563_v12 = vpop.permute.xlu0 %1562 }
 0x4e1   :  { %v1812_v20 = vsel %vm1803_vm13, %v1795_v50, %v1563_v12  ;;  %v1765_v59 = vsel %vm703_vm6, %v1749_v51, %v1421_v44  ;;  %v4839_v44 = vld [vmem:[#allocation7_spill] sm:$0xff] }
 0x4e4   :  { %v1612_v19 = vpop.permute.xlu1 %1611  ;;  %v1565_v36 = vpop.permute.xlu0 %1564 }
 0x4e5   :  { %v1829_v1 = vsel %vm1820_vm14, %v1812_v20, %v1612_v19  ;;  %v1813_v41 = vsel %vm1803_vm13, %v1796_v10, %v1565_v36  ;;  %v4840_v19 = vld [vmem:[#allocation10_spill] sm:$0xff]  ;;  %v4841_v20 = vld [vmem:[#allocation9_spill] sm:$0xff] }
 0x4e6   :  { %v1846_v14 = vsel %vm1837_vm15, %v1829_v1, %v4318_v58 }
 0x4e8   :  { %v1470_v25 = vpop.permute.xlu1 %1469  ;;  %v1423_v5 = vpop.permute.xlu0 %1422 }
 0x4e9   :  { %v1781_v42 = vsel %vm737_vm8, %v1765_v59, %v1470_v25  ;;  %v1766_v54 = vsel %vm703_vm6, %v4322_v26, %v1423_v5  ;;  %v1883_v5 = vld [vmem:[%s4805_s8 + $0x60] sm:$0xff] }
 0x4ea   :  { %v1797_v37 = vsel %vm771_vm10, %v1781_v42, %v4328_v57 }
 0x4ec   :  { %v1708_v32 = vpop.permute.xlu1 %1707  ;;  %v1614_v6 = vpop.permute.xlu0 %1613 }
 0x4ed   :  { %v1863_v47 = vsel %vm1854_vm2, %v1846_v14, %v1708_v32  ;;  %v1830_v21 = vsel %vm1820_vm14, %v1813_v41, %v1614_v6 }
 0x4ee   :  { %v1895_v15 = vmul.f32 %v1879_v39, %v1863_v47  ;;  %v1847_v28 = vsel %vm1837_vm15, %v1830_v21, %v4330_v0  ;;  %v4842_v39 = vld [vmem:[#allocation14_spill] sm:$0xff]  ;;  %v4843_v47 = vld [vmem:[#allocation12_spill] sm:$0xff] }
 0x4f0   :  { %v1710_v9 = vpop.permute.xlu1 %1709  ;;  %2647 = vmatprep.mubr.msk.f32.mxu1 %vm1912_vm3, %v1895_v15  ;;  %v1472_v29 = vpop.permute.xlu0 %1471 }
 0x4f1   :  { %v1864_v31 = vsel %vm1854_vm2, %v1847_v28, %v1710_v9  ;;  %v1782_v46 = vsel %vm737_vm8, %v1766_v54, %v1472_v29  ;;  %v4844_v29 = vld [vmem:[#allocation13_spill] sm:$0xff] }
 0x4f2   :  { %v1896_v58 = vmul.f32 %v1880_v34, %v1864_v31  ;;  %v1798_v7 = vsel %vm771_vm10, %v1782_v46, %v4336_v11  ;;  %v1882_v11 = vld [vmem:[%s4805_s8 + $0x58] sm:$0xff] }
 0x4f4   :  { %v1425_v52 = vpop.permute.xlu1 %1424  ;;  %2648 = vmatmul.mubr.msk.f32.gmra.mrb[10].mxu1 %vm1912_vm3, %v1896_v58  ;;  %v1567_v45 = vpop.permute.xlu0 %1566  ;;  %v4845_v58 = vld [vmem:[#allocation15_spill] sm:$0xff] }
 0x4f5   :  { %v1814_v3 = vsel %vm1803_vm13, %v1797_v37, %v1567_v45  ;;  %v1767_v12 = vsel %vm703_vm6, %v4839_v44, %v1425_v52  ;;  %v1884_v45 = vld [vmem:[%s4805_s8 + $0x68] sm:$0xff] }
 0x4f8   :  { %v1616_v33 = vpop.permute.xlu1 %1615  ;;  %v1569_v0 = vpop.permute.xlu0 %1568 }
 0x4f9   :  { %v1831_v13 = vsel %vm1820_vm14, %v1814_v3, %v1616_v33  ;;  %v1815_v26 = vsel %vm1803_vm13, %v1798_v7, %v1569_v0  ;;  %v4846_v33 = vld [vmem:[#allocation17_spill] sm:$0xff]  ;;  %v4847_v3 = vld [vmem:[#allocation16_spill] sm:$0xff] }
 0x4fa   :  { %v1848_v57 = vsel %vm1837_vm15, %v1831_v13, %v4837_v8 }
 0x4fc   :  { %v1474_v61 = vpop.permute.xlu1 %1473  ;;  %v1427_v38 = vpop.permute.xlu0 %1426 }
 0x4fd   :  { %v1783_v4 = vsel %vm737_vm8, %v1767_v12, %v1474_v61  ;;  %v1768_v25 = vsel %vm703_vm6, %v4841_v20, %v1427_v38  ;;  %v4848_v38 = vld [vmem:[#allocation18_spill] sm:$0xff] }
 0x4fe   :  { %v1799_v36 = vsel %vm771_vm10, %v1783_v4, %v4840_v19  ;;  %v4851_v19 = vmov 0.0|0.0  }
 0x500   :  { %v1712_v17 = vpop.permute.xlu1 %1711  ;;  %v1618_v56 = vpop.permute.xlu0 %1617 }
 0x501   :  { %v1865_v22 = vsel %vm1854_vm2, %v1848_v57, %v1712_v17  ;;  %v1832_v24 = vsel %vm1820_vm14, %v1815_v26, %v1618_v56  ;;  %v1886_v56 = vld [vmem:[%s4805_s8 + $0x78] sm:$0xff] }
 0x502   :  { %v1897_v2 = vmul.f32 %v1881_v55, %v1865_v22  ;;  %v1849_v18 = vsel %vm1837_vm15, %v1832_v24, %v4838_v35  ;;  %v1885_v22 = vld [vmem:[%s4805_s8 + $0x70] sm:$0xff] }
 0x504   :  { %v1714_v16 = vpop.permute.xlu1 %1713  ;;  %2650 = vmatprep.mubr.msk.f32.mxu1 %vm1912_vm3, %v1897_v2  ;;  %v1476_v49 = vpop.permute.xlu0 %1475  ;;  %v4849_v2 = vld [vmem:[#allocation6_spill] sm:$0xff] }
 0x505   :  { %v1866_v63 = vsel %vm1854_vm2, %v1849_v18, %v1714_v16  ;;  %v1784_v1 = vsel %vm737_vm8, %v1768_v25, %v1476_v49  ;;  %v4850_v16 = vld [vmem:[#allocation19_spill] sm:$0xff] }
 0x506   :  { %v1898_v27 = vmul.f32 %v1882_v11, %v1866_v63  ;;  %v1800_v21 = vsel %vm771_vm10, %v1784_v1, %v4843_v47 }
 0x508   :  { %v1429_v53 = vpop.permute.xlu1 %1428  ;;  %2651 = vmatmul.mubr.msk.f32.gmra.mrb[12].mxu1 %vm1912_vm3, %v1898_v27  ;;  %v1571_v43 = vpop.permute.xlu0 %1570 }
 0x509   :  { %v1816_v23 = vsel %vm1803_vm13, %v1799_v36, %v1571_v43  ;;  %v1769_v31 = vsel %vm703_vm6, %v4844_v29, %v1429_v53 }
 0x50c   :  { %v1620_v40 = vpop.permute.xlu1 %1619  ;;  %v1573_v48 = vpop.permute.xlu0 %1572 }
 0x50d   :  { %v1833_v60 = vsel %vm1820_vm14, %v1816_v23, %v1620_v40  ;;  %v1817_v15 = vsel %vm1803_vm13, %v1800_v21, %v1573_v48 }
 0x50e   :  { %v1850_v41 = vsel %vm1837_vm15, %v1833_v60, %v4842_v39 }
 0x510   :  { %v1478_v30 = vpop.permute.xlu1 %1477  ;;  %v1431_v50 = vpop.permute.xlu0 %1430 }
 0x511   :  { %v1770_v52 = vsel %vm703_vm6, %v4845_v58, %v1431_v50  ;;  %v1785_v51 = vsel %vm737_vm8, %v1769_v31, %v1478_v30 }
 0x512   :  { %v1801_v61 = vsel %vm771_vm10, %v1785_v51, %v4847_v3 }
 0x514   :  { %v1716_v10 = vpop.permute.xlu1 %1715  ;;  %v1622_v32 = vpop.permute.xlu0 %1621 }
 0x515   :  { %v1867_v14 = vsel %vm1854_vm2, %v1850_v41, %v1716_v10  ;;  %v1834_v28 = vsel %vm1820_vm14, %v1817_v15, %v1622_v32 }
 0x516   :  { %v1899_v6 = vmul.f32 %v1883_v5, %v1867_v14  ;;  %v1851_v0 = vsel %vm1837_vm15, %v1834_v28, %v4846_v33 }
 0x518   :  { %v1575_v34 = vpop.permute.xlu1 %1574  ;;  %2653 = vmatprep.mubr.msk.f32.mxu1 %vm1912_vm3, %v1899_v6  ;;  %v1480_v9 = vpop.permute.xlu0 %1479 }
 0x519   :  { %v1786_v59 = vsel %vm737_vm8, %v1770_v52, %v1480_v9  ;;  %v1818_v7 = vsel %vm1803_vm13, %v1801_v61, %v1575_v34 }
 0x51a   :  { %v1802_v13 = vsel %vm771_vm10, %v1786_v59, %v4848_v38 }
 0x51c   :  { %v1577_v42 = vpop.permute.xlu1 %1576  ;;  %v1718_v54 = vpop.permute.xlu0 %1717 }
 0x51d   :  { %v1868_v37 = vsel %vm1854_vm2, %v1851_v0, %v1718_v54  ;;  %v1819_v55 = vsel %vm1803_vm13, %v1802_v13, %v1577_v42 }
 0x51e   :  { %v1900_v46 = vmul.f32 %v1884_v45, %v1868_v37 }
 0x520   :  { %v1626_v26 = vpop.permute.xlu1 %1625  ;;  %2654 = vmatmul.mubr.msk.f32.gmra.mrb[14].mxu1 %vm1912_vm3, %v1900_v46  ;;  %v1624_v17 = vpop.permute.xlu0 %1623 }
 0x521   :  { %v1836_v8 = vsel %vm1820_vm14, %v1819_v55, %v1626_v26  ;;  %v1835_v57 = vsel %vm1820_vm14, %v1818_v7, %v1624_v17  ;;  %v4852_v17 = vmov 1.0  }
 0x522   :  { %v1853_v11 = vsel %vm1837_vm15, %v1836_v8, %v4849_v2  ;;  %v1852_v35 = vsel %vm1837_vm15, %v1835_v57, %v4850_v16 }
 0x524   :  { %v1722_v24 = vpop.permute.xlu1 %1721  ;;  %v1720_v18 = vpop.permute.xlu0 %1719 }
 0x525   :  { %v1870_v49 = vsel %vm1854_vm2, %v1853_v11, %v1722_v24  ;;  %v1869_v63 = vsel %vm1854_vm2, %v1852_v35, %v1720_v18 }
 0x526   :  { %v1902_v27 = vmul.f32 %v1886_v56, %v1870_v49  ;;  %v1901_v53 = vmul.f32 %v1885_v22, %v1869_v63  ;;  %v2267_v49 = vld [vmem:[%s4802_s5] sm:$0x1]  ;;  %s2913_s5 = smov [#allocation2]  }
 0x528   :  { %2656 = vmatprep.mubr.msk.f32.mxu1 %vm1912_vm3, %v1901_v53  ;;  %v2271_v53 = vld [vmem:[%s4803_s6] sm:$0x1]  ;;  %s2355_s6 = sshll.u32 %s2913_s5, 4  ;;  %s2356_s6 = int_to_ptr.vmem [resolvable:$true] %s2355_s6 }
 0x529   :  { %2657 = vmatmul.mubr.msk.f32.gmra.mrb[16].mxu1 %vm1912_vm3, %v1902_v27  ;;  %s2872_s1 = scalar_lea.vmem %s2356_s6, 2048  ;;  %p2877_p1 = scmp.lt.s32.totalorder %s2356_s6, %s2356_s6 }
 0x52a   :  { %2726 = vmatprep.mubr.msk.f32.mxu1 %vm2907_vm12, %v4836_v62  ;;  %p2873_p0 = scmp.ne.s32.totalorder %s2356_s6, %s2872_s1  ;;  %p2878_p2 = scmp.lt.s32.totalorder %s2872_s1, %s2872_s1 }
 0x52c   :  { %p2879_p3 = por %p2878_p2, %p2877_p1 }
 0x52e   :  { %p2880_p4 = pnand %p2879_p3, %p2873_p0 }
 0x577   :  { %v4700_v43 = vpop.f32.mrb[2].mxu1 }
 0x578   :  { %v2177_v44 = vmul.f32 %v4700_v43, %v4700_v43  ;;  %v4704_v12 = vpop.f32.mrb[3].mxu1 }
 0x579   :  { %v2802_v4 = vpack.c.bf16 %v4700_v43, %v4704_v12  ;;  %v2176_v40 = vmul.f32 %v4704_v12, %v4704_v12 }
 0x57b   :  { %v2826_v48 = vpack.c.bf16 %v2177_v44, %v2176_v40  ;;  %2803 = vmatpush3.bf16.msra.mxu0 %v2802_v4  ;;  %v4853_v4 = vld [vmem:[#allocation5_spill] sm:$0xff] }
 0x57c   :  { %2804 = vmatprep.subr.bf16.mxu0 %v4851_v19 }
 0x57d   :  { %2827 = vmatpush3.bf16.msra.mxu1 %v2826_v48 }
 0x57e   :  { %2828 = vmatprep.subr.bf16.mxu1 %v4851_v19 }
 0x58b   :  { %v4712_v62 = vpop.f32.mrb[4].mxu1 }
 0x58c   :  { %v2179_v36 = vmul.f32 %v4712_v62, %v4712_v62  ;;  %v4716_v23 = vpop.f32.mrb[5].mxu1 }
 0x58d   :  { %v2805_v30 = vpack.c.bf16 %v4712_v62, %v4716_v23  ;;  %v2178_v50 = vmul.f32 %v4716_v23, %v4716_v23 }
 0x58f   :  { %v2829_v60 = vpack.c.bf16 %v2179_v36, %v2178_v50  ;;  %2806 = vmatpush3.bf16.msra.mxu0 %v2805_v30 }
 0x590   :  { %2807 = vmatprep.subr.bf16.mxu0 %v4851_v19 }
 0x591   :  { %2830 = vmatpush3.bf16.msra.mxu1 %v2829_v60 }
 0x592   :  { %2831 = vmatprep.subr.bf16.mxu1 %v4851_v19 }
 0x59f   :  { %v4724_v20 = vpop.f32.mrb[6].mxu1 }
 0x5a0   :  { %v2181_v25 = vmul.f32 %v4724_v20, %v4724_v20  ;;  %v4728_v5 = vpop.f32.mrb[7].mxu1 }
 0x5a1   :  { %v2808_v1 = vpack.c.bf16 %v4724_v20, %v4728_v5  ;;  %v2180_v10 = vmul.f32 %v4728_v5, %v4728_v5 }
 0x5a3   :  { %v2832_v39 = vpack.c.bf16 %v2181_v25, %v2180_v10  ;;  %2809 = vmatpush3.bf16.msra.mxu0 %v2808_v1 }
 0x5a4   :  { %2810 = vmatprep.subr.bf16.mxu0 %v4851_v19 }
 0x5a5   :  { %2833 = vmatpush3.bf16.msra.mxu1 %v2832_v39 }
 0x5a6   :  { %2834 = vmatprep.subr.bf16.mxu1 %v4851_v19 }
 0x5b3   :  { %v4736_v41 = vpop.f32.mrb[8].mxu1 }
 0x5b4   :  { %v2183_v32 = vmul.f32 %v4736_v41, %v4736_v41  ;;  %v4740_v14 = vpop.f32.mrb[9].mxu1 }
 0x5b5   :  { %v2811_v6 = vpack.c.bf16 %v4736_v41, %v4740_v14  ;;  %v2182_v47 = vmul.f32 %v4740_v14, %v4740_v14 }
 0x5b7   :  { %v2835_v21 = vpack.c.bf16 %v2183_v32, %v2182_v47  ;;  %2812 = vmatpush3.bf16.msra.mxu0 %v2811_v6 }
 0x5b8   :  { %2813 = vmatprep.subr.bf16.mxu0 %v4851_v19 }
 0x5b9   :  { %2836 = vmatpush3.bf16.msra.mxu1 %v2835_v21 }
 0x5ba   :  { %2837 = vmatprep.subr.bf16.mxu1 %v4851_v19 }
 0x5c7   :  { %v4748_v15 = vpop.f32.mrb[10].mxu1 }
 0x5c8   :  { %v2185_v34 = vmul.f32 %v4748_v15, %v4748_v15  ;;  %v4752_v9 = vpop.f32.mrb[11].mxu1 }
 0x5c9   :  { %v2814_v28 = vpack.c.bf16 %v4748_v15, %v4752_v9  ;;  %v2184_v29 = vmul.f32 %v4752_v9, %v4752_v9 }
 0x5cb   :  { %v2838_v31 = vpack.c.bf16 %v2185_v34, %v2184_v29  ;;  %2815 = vmatpush3.bf16.msra.mxu0 %v2814_v28 }
 0x5cc   :  { %2816 = vmatprep.subr.bf16.mxu0 %v4851_v19 }
 0x5cd   :  { %2839 = vmatpush3.bf16.msra.mxu1 %v2838_v31 }
 0x5ce   :  { %2840 = vmatprep.subr.bf16.mxu1 %v4851_v19 }
 0x5db   :  { %v2652_v58 = vpop.f32.mrb[12].mxu1 }
 0x5dc   :  { %v2187_v52 = vmul.f32 %v2652_v58, %v2652_v58  ;;  %v2077_v45 = vpop.f32.mrb[13].mxu1 }
 0x5dd   :  { %v2817_v51 = vpack.c.bf16 %v2652_v58, %v2077_v45  ;;  %v2186_v59 = vmul.f32 %v2077_v45, %v2077_v45 }
 0x5df   :  { %v2841_v42 = vpack.c.bf16 %v2187_v52, %v2186_v59  ;;  %2818 = vmatpush3.bf16.msra.mxu0 %v2817_v51 }
 0x5e0   :  { %2819 = vmatprep.subr.bf16.mxu0 %v4851_v19 }
 0x5e1   :  { %2842 = vmatpush3.bf16.msra.mxu1 %v2841_v42 }
 0x5e2   :  { %2843 = vmatprep.subr.bf16.mxu1 %v4851_v19 }
 0x5f3   :  { %v2655_v33 = vpop.f32.mrb[14].mxu1 }
 0x5f4   :  { %v2189_v0 = vmul.f32 %v2655_v33, %v2655_v33  ;;  %v2087_v54 = vpop.f32.mrb[15].mxu1 }
 0x5f5   :  { %v2820_v37 = vpack.c.bf16 %v2655_v33, %v2087_v54  ;;  %v2188_v46 = vmul.f32 %v2087_v54, %v2087_v54 }
 0x5f7   :  { %v2844_v3 = vpack.c.bf16 %v2189_v0, %v2188_v46  ;;  %2821 = vmatpush3.bf16.msra.mxu0 %v2820_v37 }
 0x5f8   :  { %2822 = vmatprep.subr.bf16.mxu0 %v4851_v19 }
 0x5f9   :  { %2845 = vmatpush3.bf16.msra.mxu1 %v2844_v3 }
 0x5fa   :  { %2846 = vmatprep.subr.bf16.mxu1 %v4851_v19 }
 0x5fc   :  { %v2658_v61 = vpop.f32.mrb[16].mxu1 }
 0x5fd   :  { %v2191_v38 = vmul.f32 %v2658_v61, %v2658_v61  ;;  %v2097_v13 = vpop.f32.mrb[17].mxu1 }
 0x5fe   :  { %v2823_v7 = vpack.c.bf16 %v2658_v61, %v2097_v13  ;;  %v2190_v55 = vmul.f32 %v2097_v13, %v2097_v13 }
 0x600   :  { %v2847_v26 = vpack.c.bf16 %v2191_v38, %v2190_v55  ;;  %2824 = vmatpush3.bf16.msra.mxu0 %v2823_v7 }
 0x602   :  { %2848 = vmatpush3.bf16.msra.mxu1 %v2847_v26 }
 0x603   :  { %2692 = vmatmul.mubr.f32.vlgmr.msra.gmra.mrb[18].mxu0 %v4852_v17 }
 0x605   :  { %2727 = vmatmul.mubr.f32.vlgmr.msra.gmra.mrb[18].mxu1 %v4852_v17 }
 0x6d6   :  { %v2172_v8 = vpop.f32.mrb[18].mxu0 }
 0x6d7   :  { %v2262_v57 = vmul.f32 0.0078125, %v2172_v8  ;;  %v2693_v56 = vpop.f32.mrb[19].mxu0 }
 0x6d8   :  { %v2258_v22 = vpop.f32.mrb[18].mxu1 }
 0x6d9   :  { %v2264_v24 = vmul.f32 %v2262_v57, %v2262_v57  ;;  %v2263_v2 = vmul.f32 0.0078125, %v2258_v22  ;;  %v2728_v11 = vpop.f32.mrb[19].mxu1 }
 0x6db   :  { %v2265_v16 = vsub.f32 %v2263_v2, %v2264_v24 }
 0x6dd   :  { %v2266_v35 = vmax.f32 %v2265_v16, 0.0 }
 0x6df   :  { %v2268_v18 = vadd.f32 1e-05, %v2266_v35 }
 0x6e1   :  { %2870 = vrsqrt.f32 %v2268_v18 }
 0x6eb   :  { %v2871_v63 = vpop.eup %2870 }
 0x6ec   :  { %v2270_v27 = vmul.f32 %v2871_v63, %v2267_v49 }
 0x6ee   :  { %v2272_v44 = vmul.f32 %v2270_v27, %v2262_v57  ;;  %v2278_v40 = vrot.slane %v2270_v27, %v4853_v4 }
 0x6f0   :  { %v2273_v48 = vsub.f32 %v2271_v53, %v2272_v44  ;;  %v2280_v19 = vmul.f32 %v2278_v40, %v4704_v12  ;;  %v2281_v36 = vmul.f32 %v4700_v43, %v2278_v40  ;;  %v2282_v30 = vmul.f32 %v2278_v40, %v4716_v23 }
 0x6f1   :  { %v2283_v50 = vmul.f32 %v4712_v62, %v2278_v40  ;;  %v2284_v60 = vmul.f32 %v2278_v40, %v4728_v5  ;;  %v2285_v25 = vmul.f32 %v4724_v20, %v2278_v40  ;;  %v2286_v1 = vmul.f32 %v2278_v40, %v4740_v14 }
 0x6f2   :  { %v2300_v10 = vrot.slane %v2273_v48, %v4853_v4  ;;  %v2287_v39 = vmul.f32 %v4736_v41, %v2278_v40  ;;  %v2288_v32 = vmul.f32 %v2278_v40, %v4752_v9  ;;  %v2289_v12 = vmul.f32 %v4748_v15, %v2278_v40 }
 0x6f3   :  { %v2290_v6 = vmul.f32 %v2278_v40, %v2077_v45  ;;  %v2291_v43 = vmul.f32 %v2652_v58, %v2278_v40  ;;  %v2292_v47 = vmul.f32 %v2278_v40, %v2087_v54  ;;  %v2293_v23 = vmul.f32 %v2655_v33, %v2278_v40 }
 0x6f4   :  { %v2294_v21 = vmul.f32 %v2278_v40, %v2097_v13  ;;  %v2295_v62 = vmul.f32 %v2658_v61, %v2278_v40  ;;  %v2302_v34 = vadd.f32 %v2300_v10, %v2280_v19  ;;  %v2303_v5 = vadd.f32 %v2300_v10, %v2281_v36 }
 0x6f5   :  { %v2304_v28 = vadd.f32 %v2300_v10, %v2282_v30  ;;  %v2305_v20 = vadd.f32 %v2300_v10, %v2283_v50  ;;  %v2306_v29 = vadd.f32 %v2300_v10, %v2284_v60  ;;  %v2307_v14 = vadd.f32 %v2300_v10, %v2285_v25 }
 0x6f6   :  { %v2308_v31 = vadd.f32 %v2300_v10, %v2286_v1  ;;  %v2309_v52 = vadd.f32 %v2300_v10, %v2287_v39  ;;  %v2310_v51 = vadd.f32 %v2300_v10, %v2288_v32  ;;  %v2311_v41 = vadd.f32 %v2300_v10, %v2289_v12 }
 0x6f7   :  { %v2312_v59 = vadd.f32 %v2300_v10, %v2290_v6  ;;  %v2313_v9 = vadd.f32 %v2300_v10, %v2291_v43  ;;  %v2314_v42 = vadd.f32 %v2300_v10, %v2292_v47  ;;  %v2315_v15 = vadd.f32 %v2300_v10, %v2293_v23 }
 0x6f8   :  { %v2316_v45 = vadd.f32 %v2300_v10, %v2294_v21  ;;  %v2317_v58 = vadd.f32 %v2300_v10, %v2295_v62  ;;  %v2318_v0 = vmax.f32 %v2302_v34, 0.0  ;;  %v2319_v33 = vmax.f32 %v2303_v5, 0.0 }
 0x6f9   :  { %v2320_v54 = vmax.f32 %v2304_v28, 0.0  ;;  %v2321_v37 = vmax.f32 %v2305_v20, 0.0  ;;  %v2322_v46 = vmax.f32 %v2306_v29, 0.0  ;;  %v2323_v3 = vmax.f32 %v2307_v14, 0.0 }
 0x6fa   :  { %v2324_v61 = vmax.f32 %v2308_v31, 0.0  ;;  %v2325_v38 = vmax.f32 %v2309_v52, 0.0  ;;  %v2326_v13 = vmax.f32 %v2310_v51, 0.0  ;;  %v2327_v7 = vmax.f32 %v2311_v41, 0.0  ;;  %2334 = vst [vmem:[#allocation2] sm:$0xff] %v2318_v0  ;;  %2335 = vst [vmem:[#allocation2 + $0x8] sm:$0xff] %v2319_v33 }
 0x6fb   :  { %v2328_v55 = vmax.f32 %v2312_v59, 0.0  ;;  %v2329_v26 = vmax.f32 %v2313_v9, 0.0  ;;  %v2330_v17 = vmax.f32 %v2314_v42, 0.0  ;;  %v2331_v8 = vmax.f32 %v2315_v15, 0.0  ;;  %2336 = vst [vmem:[#allocation2 + $0x10] sm:$0xff] %v2320_v54  ;;  %2337 = vst [vmem:[#allocation2 + $0x18] sm:$0xff] %v2321_v37 }
 0x6fc   :  { %2338 = vst [vmem:[#allocation2 + $0x20] sm:$0xff] %v2322_v46  ;;  %2339 = vst [vmem:[#allocation2 + $0x28] sm:$0xff] %v2323_v3  ;;  %v2332_v57 = vmax.f32 %v2316_v45, 0.0  ;;  %v2333_v56 = vmax.f32 %v2317_v58, 0.0 }
 0x6fd   :  { %2340 = vst [vmem:[#allocation2 + $0x30] sm:$0xff] %v2324_v61  ;;  %2341 = vst [vmem:[#allocation2 + $0x38] sm:$0xff] %v2325_v38 }
 0x6fe   :  { %2342 = vst [vmem:[#allocation2 + $0x40] sm:$0xff] %v2326_v13  ;;  %2343 = vst [vmem:[#allocation2 + $0x48] sm:$0xff] %v2327_v7 }
 0x6ff   :  { %2344 = vst [vmem:[#allocation2 + $0x50] sm:$0xff] %v2328_v55  ;;  %2345 = vst [vmem:[#allocation2 + $0x58] sm:$0xff] %v2329_v26 }
 0x700   :  { %2346 = vst [vmem:[#allocation2 + $0x60] sm:$0xff] %v2330_v17  ;;  %2347 = vst [vmem:[#allocation2 + $0x68] sm:$0xff] %v2331_v8 }
 0x701   :  { %2348 = vst [vmem:[#allocation2 + $0x70] sm:$0xff] %v2332_v57  ;;  %2349 = vst [vmem:[#allocation2 + $0x78] sm:$0xff] %v2333_v56 }
 0x702   :  { %2883 = shalt.err (!%p2880_p4)
}
 0x703   :  { %s2884_s11 = scalar_lea.hbm %s4806_s9, 2048 }
 0x704   :  { %p2885_p5 = scmp.ne.s32.totalorder %s4806_s9, %s2884_s11  ;;  %p2888_p6 = scmp.lt.u32.totalorder %s2884_s11, %s4806_s9 }
 0x706   :  { %p2890_p7 = pnand %p2888_p6, %p2885_p5 }
 0x708   :  { %2893 = shalt.err (!%p2890_p7)
}
 0x709   :  { %s2914_s18 = smov 128  }
 0x70a   :  { %2361 = dma.vmem_to_hbm [thread:$0]  %s2356_s6, 2048, %s4806_s9, [#allocation3], %s2914_s18, %s2914_s18, %s2901_s14  }
 0x70b   :  { %2894 = dma.done.wait [#allocation3], 2048  }
 0x70c   :  { %2895 = vsyncadd [#allocation3], 4294965248 }
 0x70d   :  { %2365 = vsyncpa [#allocation3], 1 }

</bundles_post_ra>
